<compile_context>
chip_gen: v5e
topology: v5e:2x2
jax: 0.10.0
libtpu: 0.0.40
codegen_flags: <defaults>
</compile_context>

<pallas_src>
import functools

import jax
import jax.numpy as jnp
from jax.experimental import pallas as pl
from jax.experimental.pallas import tpu as pltpu

# ---- model hyperparameters (module-level globals in the PyTorch script) ----
vocab_size = 64
embedding_size = 32
sequence_length = 8
num_heads = 4
num_layers = 2
dropout_rate = 0.0                 # eval mode -> dropout is identity
head_size = embedding_size // num_heads
LN_EPS = 1e-5                      # PyTorch nn.LayerNorm default eps
VPAD = 128                         # LM-head logits padded to a full 128-lane tile


def _layernorm(x, g, b):
    # x: (T, E) f32, g/b: (1, E) f32
    mu = jnp.mean(x, axis=-1, keepdims=True)
    var = jnp.mean((x - mu) ** 2, axis=-1, keepdims=True)
    return (x - mu) * jax.lax.rsqrt(var + LN_EPS) * g + b


# ---------------------------------------------------------------------------
# Fused kernel: one grid step == one batch element.
# ---------------------------------------------------------------------------
def fused_forward_kernel(idx_ref, tok_ref, pos_ref,
                         ln1g_ref, ln1b_ref, wqk_ref, wvp_ref, bp_ref,
                         ln2g_ref, ln2b_ref, w1_ref, b1_ref, w2_ref, b2_ref,
                         lnfg_ref, lnfb_ref, wout_ref, bout_ref,
                         o_ref, *, seq, n_heads, n_layers):
    T, H = seq, n_heads
    V, E = tok_ref.shape
    bf16 = jnp.bfloat16

    # ---- token embedding gather (one-hot @ table on the MXU) + positions ----
    # TODO(synk): at larger batch*vocab, replace the one-hot gather with a
    # scalar-prefetched index + pl.Element row-gather BlockSpec.
    ids = idx_ref[...]                                               # (T, 1) int32
    vocab_iota = jax.lax.broadcasted_iota(jnp.int32, (T, V), 1)
    onehot = jnp.where(vocab_iota == ids, 1.0, 0.0).astype(bf16)     # (T, V)
    x = jnp.dot(onehot, tok_ref[...], preferred_element_type=jnp.float32)
    x = x + pos_ref[...]                                             # (T, E) f32

    # causal mask; every row keeps its diagonal, so softmax never sees an all -inf row
    row = jax.lax.broadcasted_iota(jnp.int32, (T, T), 0)
    col = jax.lax.broadcasted_iota(jnp.int32, (T, T), 1)
    causal = row >= col

    for l in range(n_layers):                                        # static unroll
        # ---- x = x + MultiHeadAttention(LayerNorm1(x)) ----
        xn = _layernorm(x, ln1g_ref[l], ln1b_ref[l])                 # (T, E) f32
        xn_b = xn.astype(bf16)
        att = jnp.zeros_like(x)
        for h in range(H):                                           # static unroll
            w = l * H + h
            # s_h = xn @ (scale * Wq_h Wk_h^T) @ xn^T   (folded at init, exact algebra)
            t1 = jnp.dot(xn_b, wqk_ref[w], preferred_element_type=jnp.float32)
            s = jax.lax.dot_general(
                t1.astype(bf16), xn_b,
                dimension_numbers=(((1,), (1,)), ((), ())),
                preferred_element_type=jnp.float32)                  # (T, T)
            s = jnp.where(causal, s, -jnp.inf)
            s = s - jnp.max(s, axis=-1, keepdims=True)
            p = jnp.exp(s)
            p = p * pl.reciprocal(jnp.sum(p, axis=-1, keepdims=True), approx=False)
            # out_h @ Wp_h == p @ (xn @ (Wv_h Wp_h))   (folded at init)
            t2 = jnp.dot(xn_b, wvp_ref[w], preferred_element_type=jnp.float32)
            att = att + jnp.dot(p.astype(bf16), t2.astype(bf16),
                                preferred_element_type=jnp.float32)
        x = x + att + bp_ref[l]                                      # proj bias once

        # ---- x = x + FeedForward(LayerNorm2(x)) ----
        xn2 = _layernorm(x, ln2g_ref[l], ln2b_ref[l])
        h1 = jnp.dot(xn2.astype(bf16), w1_ref[l],
                     preferred_element_type=jnp.float32) + b1_ref[l]
        h1 = jnp.maximum(h1, 0.0)                                    # ReLU
        x = x + jnp.dot(h1.astype(bf16), w2_ref[l],
                        preferred_element_type=jnp.float32) + b2_ref[l]

    # ---- final LayerNorm + lane-dense (128-wide, vocab padded) LM head ----
    xn = _layernorm(x, lnfg_ref[...], lnfb_ref[...])
    o_ref[...] = jnp.dot(xn.astype(bf16), wout_ref[...],
                         preferred_element_type=jnp.float32) + bout_ref[...]


def _resident_spec(a):
    """Full-array block whose index never changes -> weight stays VMEM-resident."""
    zeros = (0,) * a.ndim
    return pl.BlockSpec(a.shape, lambda b: zeros)


# ---------------------------------------------------------------------------
# Wrapper: single fused pallas_call, grid over batch (megacore-parallel on v7x).
# ---------------------------------------------------------------------------
def transformer_language_model(idx, kp):
    """Forward pass (targets=None path): returns logits (B, T, vocab_size)."""
    B, T = idx.shape
    kernel = functools.partial(fused_forward_kernel, seq=T,
                               n_heads=num_heads, n_layers=num_layers)
    args = (
        idx.reshape(B * T, 1).astype(jnp.int32),
        kp["tok_emb"], kp["pos_emb"],
        kp["ln1_g"], kp["ln1_b"], kp["wqk"], kp["wvp"], kp["bp"],
        kp["ln2_g"], kp["ln2_b"], kp["w1"], kp["b1"], kp["w2"], kp["b2"],
        kp["lnf_g"], kp["lnf_b"], kp["w_out"], kp["b_out"],
    )
    in_specs = [pl.BlockSpec((T, 1), lambda b: (b, 0))]              # per-batch ids
    in_specs += [_resident_spec(a) for a in args[1:]]                # resident weights

    logits = pl.pallas_call(
        kernel,
        out_shape=jax.ShapeDtypeStruct((B * T, VPAD), jnp.float32),
        grid_spec=pltpu.PrefetchScalarGridSpec(
            num_scalar_prefetch=0,
            grid=(B,),
            in_specs=in_specs,
            out_specs=pl.BlockSpec((T, VPAD), lambda b: (b, 0)),
        ),
        compiler_params=pltpu.CompilerParams(
            dimension_semantics=("parallel",)),
    )(*args)
    return logits[:, :vocab_size].reshape(B, T, vocab_size)
    # TODO(synk): cross-entropy loss (targets path) and autoregressive generate()
    # multinomial sampling are host-side glue and are not implemented in-kernel.


# ---------------------------------------------------------------------------
# Parameters: logical (PyTorch-equivalent, f32, weights stored as (in, out)),
# plus a one-time preparation step into the kernel layout.
# ---------------------------------------------------------------------------
def init_params(key):
    E, Hd, V, T, L = (embedding_size, 4 * embedding_size, vocab_size,
                      sequence_length, num_layers)
    keys = iter(jax.random.split(key, 16))

    def nrm(shape, scale=0.02):
        return (scale * jax.random.normal(next(keys), shape)).astype(jnp.float32)

    return {
        "tok_emb": nrm((V, E)),
        "pos_emb": nrm((T, E)),
        "ln1_g": jnp.ones((L, E), jnp.float32), "ln1_b": jnp.zeros((L, E), jnp.float32),
        "wq": nrm((L, E, E)), "wk": nrm((L, E, E)), "wv": nrm((L, E, E)),
        "wp": nrm((L, E, E)), "bp": jnp.zeros((L, E), jnp.float32),
        "ln2_g": jnp.ones((L, E), jnp.float32), "ln2_b": jnp.zeros((L, E), jnp.float32),
        "w1": nrm((L, E, Hd)), "b1": jnp.zeros((L, Hd), jnp.float32),
        "w2": nrm((L, Hd, E)), "b2": jnp.zeros((L, E), jnp.float32),
        "lnf_g": jnp.ones((E,), jnp.float32), "lnf_b": jnp.zeros((E,), jnp.float32),
        "w_out": nrm((E, V)), "b_out": jnp.zeros((V,), jnp.float32),
    }


def prepare_params(p):
    """One-time preprocessing: per-head fold, vocab padding, bf16 weight cast."""
    L, E, H, hs, V = num_layers, embedding_size, num_heads, head_size, vocab_size
    scale = float(E) ** -0.5                       # PyTorch uses x.shape[-1]**-0.5 == E**-0.5
    # per-head split: columns of Wq/Wk/Wv, rows of Wp (torch concat order)
    wq = p["wq"].reshape(L, E, H, hs).transpose(0, 2, 1, 3)   # (L, H, E, hs)
    wk = p["wk"].reshape(L, E, H, hs).transpose(0, 2, 1, 3)
    wv = p["wv"].reshape(L, E, H, hs).transpose(0, 2, 1, 3)
    wp = p["wp"].reshape(L, H, hs, E)                         # (L, H, hs, E)
    wqk = (scale * jnp.einsum("lhek,lhfk->lhef", wq, wk)).reshape(L * H, E, E)
    wvp = jnp.einsum("lhek,lhkf->lhef", wv, wp).reshape(L * H, E, E)
    w_out = jnp.zeros((E, VPAD), jnp.float32).at[:, :V].set(p["w_out"])
    b_out = jnp.zeros((1, VPAD), jnp.float32).at[0, :V].set(p["b_out"])
    bf = lambda a: a.astype(jnp.bfloat16)
    return {
        "tok_emb": bf(p["tok_emb"]), "pos_emb": p["pos_emb"],
        "ln1_g": p["ln1_g"][:, None, :], "ln1_b": p["ln1_b"][:, None, :],
        "wqk": bf(wqk), "wvp": bf(wvp), "bp": p["bp"][:, None, :],
        "ln2_g": p["ln2_g"][:, None, :], "ln2_b": p["ln2_b"][:, None, :],
        "w1": bf(p["w1"]), "b1": p["b1"][:, None, :],
        "w2": bf(p["w2"]), "b2": p["b2"][:, None, :],
        "lnf_g": p["lnf_g"][None, :], "lnf_b": p["lnf_b"][None, :],
        "w_out": bf(w_out), "b_out": b_out,
    }


# ---------------------------------------------------------------------------
# Pure-JAX reference implementing the PyTorch module verbatim (f32, unfolded).
# ---------------------------------------------------------------------------
def _layernorm_ref(x, g, b):
    mu = jnp.mean(x, axis=-1, keepdims=True)
    var = jnp.mean((x - mu) ** 2, axis=-1, keepdims=True)
    return (x - mu) * jax.lax.rsqrt(var + LN_EPS) * g + b


def reference_forward(idx, p):
    B, T = idx.shape
    E, H, hs = embedding_size, num_heads, head_size
    x = p["tok_emb"][idx] + p["pos_emb"][:T][None, :, :]
    scale = float(E) ** -0.5
    causal = jnp.tril(jnp.ones((T, T), dtype=bool))
    for l in range(num_layers):
        xn = _layernorm_ref(x, p["ln1_g"][l], p["ln1_b"][l])
        heads = []
        for h in range(H):
            cols = slice(h * hs, (h + 1) * hs)
            q = xn @ p["wq"][l][:, cols]
            k = xn @ p["wk"][l][:, cols]
            v = xn @ p["wv"][l][:, cols]
            s = (q @ jnp.swapaxes(k, -1, -2)) * scale
            s = jnp.where(causal, s, -jnp.inf)
            heads.append(jax.nn.softmax(s, axis=-1) @ v)
        x = x + jnp.concatenate(heads, axis=-1) @ p["wp"][l] + p["bp"][l]
        xn2 = _layernorm_ref(x, p["ln2_g"][l], p["ln2_b"][l])
        ff = jnp.maximum(xn2 @ p["w1"][l] + p["b1"][l], 0.0) @ p["w2"][l] + p["b2"][l]
        x = x + ff
    xn = _layernorm_ref(x, p["lnf_g"], p["lnf_b"])
    return xn @ p["w_out"] + p["b_out"]


if __name__ == "__main__":
    key = jax.random.PRNGKey(0)
    pkey, ikey = jax.random.split(key)
    logical_params = init_params(pkey)
    kernel_params = prepare_params(logical_params)

    batch = 2
    idx = jax.random.randint(ikey, (batch, sequence_length), 0, vocab_size,
                             dtype=jnp.int32)

    forward = jax.jit(transformer_language_model)
    logits = jax.block_until_ready(forward(idx, kernel_params))

    assert logits.shape == (batch, sequence_length, vocab_size)
    assert bool(jnp.all(jnp.isfinite(logits)))

    ref = reference_forward(idx, logical_params)
    max_err = float(jnp.max(jnp.abs(logits - ref)))
    assert max_err < 2e-2, f"max abs error vs f32 reference: {max_err}"
    print("KERNEL_OK")
</pallas_src>

<mosaic_0001>
module attributes {stable_mosaic.version = 11 : i64} {
  func.func @fused_forward_kernel(%arg0: i32, %arg1: memref<8x1xi32, #tpu.memory_space<vmem>>, %arg2: memref<64x32xbf16, #tpu.memory_space<vmem>>, %arg3: memref<8x32xf32, #tpu.memory_space<vmem>>, %arg4: memref<2x1x32xf32, #tpu.memory_space<vmem>>, %arg5: memref<2x1x32xf32, #tpu.memory_space<vmem>>, %arg6: memref<8x32x32xbf16, #tpu.memory_space<vmem>>, %arg7: memref<8x32x32xbf16, #tpu.memory_space<vmem>>, %arg8: memref<2x1x32xf32, #tpu.memory_space<vmem>>, %arg9: memref<2x1x32xf32, #tpu.memory_space<vmem>>, %arg10: memref<2x1x32xf32, #tpu.memory_space<vmem>>, %arg11: memref<2x32x128xbf16, #tpu.memory_space<vmem>>, %arg12: memref<2x1x128xf32, #tpu.memory_space<vmem>>, %arg13: memref<2x128x32xbf16, #tpu.memory_space<vmem>>, %arg14: memref<2x1x32xf32, #tpu.memory_space<vmem>>, %arg15: memref<1x32xf32, #tpu.memory_space<vmem>>, %arg16: memref<1x32xf32, #tpu.memory_space<vmem>>, %arg17: memref<32x128xbf16, #tpu.memory_space<vmem>>, %arg18: memref<1x128xf32, #tpu.memory_space<vmem>>, %arg19: memref<8x128xf32, #tpu.memory_space<vmem>>) attributes {dimension_semantics = [#tpu.dimension_semantics<parallel>], iteration_bounds = array<i64: 2>, scalar_prefetch = 0 : i64, scratch_operands = 0 : i64, tpu.core_type = #tpu.core_type<tc>, window_params = [{transform_indices = @transform_0, window_bounds = array<i64: 8, 1>}, {pipeline_mode = #tpu.pipeline_mode<synchronous>, transform_indices = @transform_1, window_bounds = array<i64: 64, 32>}, {pipeline_mode = #tpu.pipeline_mode<synchronous>, transform_indices = @transform_2, window_bounds = array<i64: 8, 32>}, {pipeline_mode = #tpu.pipeline_mode<synchronous>, transform_indices = @transform_3, window_bounds = array<i64: 2, 1, 32>}, {pipeline_mode = #tpu.pipeline_mode<synchronous>, transform_indices = @transform_4, window_bounds = array<i64: 2, 1, 32>}, {pipeline_mode = #tpu.pipeline_mode<synchronous>, transform_indices = @transform_5, window_bounds = array<i64: 8, 32, 32>}, {pipeline_mode = #tpu.pipeline_mode<synchronous>, transform_indices = @transform_6, window_bounds = array<i64: 8, 32, 32>}, {pipeline_mode = #tpu.pipeline_mode<synchronous>, transform_indices = @transform_7, window_bounds = array<i64: 2, 1, 32>}, {pipeline_mode = #tpu.pipeline_mode<synchronous>, transform_indices = @transform_8, window_bounds = array<i64: 2, 1, 32>}, {pipeline_mode = #tpu.pipeline_mode<synchronous>, transform_indices = @transform_9, window_bounds = array<i64: 2, 1, 32>}, {pipeline_mode = #tpu.pipeline_mode<synchronous>, transform_indices = @transform_10, window_bounds = array<i64: 2, 32, 128>}, {pipeline_mode = #tpu.pipeline_mode<synchronous>, transform_indices = @transform_11, window_bounds = array<i64: 2, 1, 128>}, {pipeline_mode = #tpu.pipeline_mode<synchronous>, transform_indices = @transform_12, window_bounds = array<i64: 2, 128, 32>}, {pipeline_mode = #tpu.pipeline_mode<synchronous>, transform_indices = @transform_13, window_bounds = array<i64: 2, 1, 32>}, {pipeline_mode = #tpu.pipeline_mode<synchronous>, transform_indices = @transform_14, window_bounds = array<i64: 1, 32>}, {pipeline_mode = #tpu.pipeline_mode<synchronous>, transform_indices = @transform_15, window_bounds = array<i64: 1, 32>}, {pipeline_mode = #tpu.pipeline_mode<synchronous>, transform_indices = @transform_16, window_bounds = array<i64: 32, 128>}, {pipeline_mode = #tpu.pipeline_mode<synchronous>, transform_indices = @transform_17, window_bounds = array<i64: 1, 128>}, {transform_indices = @transform_18, window_bounds = array<i64: 8, 128>}]} {
    %c0 = arith.constant 0 : index
    %c0_0 = arith.constant 0 : index
    %0 = vector.load %arg1[%c0, %c0_0] : memref<8x1xi32, #tpu.memory_space<vmem>>, vector<8x1xi32>
    %1 = tpu.iota {dimensions = array<i32: 1>} : vector<8x64xi32>
    %2 = vector.broadcast %0 : vector<8x1xi32> to vector<8x64xi32>
    %3 = arith.cmpi eq, %1, %2 : vector<8x64xi32>
    %cst = arith.constant 1.000000e+00 : f32
    %cst_1 = arith.constant 0.000000e+00 : f32
    %4 = vector.broadcast %cst : f32 to vector<8x64xf32>
    %5 = vector.broadcast %cst_1 : f32 to vector<8x64xf32>
    %6 = arith.select %3, %4, %5 : vector<8x64xi1>, vector<8x64xf32>
    %7 = arith.truncf %6 : vector<8x64xf32> to vector<8x64xbf16>
    %c0_2 = arith.constant 0 : index
    %c0_3 = arith.constant 0 : index
    %8 = vector.load %arg2[%c0_2, %c0_3] : memref<64x32xbf16, #tpu.memory_space<vmem>>, vector<64x32xbf16>
    %cst_4 = arith.constant dense<0.000000e+00> : vector<8x32xf32>
    %9 = tpu.matmul %7, %8, %cst_4 {dimension_numbers = #tpu.dot_dimension_numbers<[1], [0], [0], [1], [0, 0, 1, 1], [], []>} : vector<8x64xbf16>, vector<64x32xbf16>, vector<8x32xf32> -> vector<8x32xf32>
    %c0_5 = arith.constant 0 : index
    %c0_6 = arith.constant 0 : index
    %10 = vector.load %arg3[%c0_5, %c0_6] : memref<8x32xf32, #tpu.memory_space<vmem>>, vector<8x32xf32>
    %11 = arith.addf %9, %10 : vector<8x32xf32>
    %12 = tpu.iota {dimensions = array<i32: 0>} : vector<8x8xi32>
    %13 = tpu.iota {dimensions = array<i32: 1>} : vector<8x8xi32>
    %14 = arith.cmpi sge, %12, %13 : vector<8x8xi32>
    %c0_7 = arith.constant 0 : index
    %c0_8 = arith.constant 0 : index
    %c0_9 = arith.constant 0 : index
    %15 = vector.load %arg4[%c0_7, %c0_8, %c0_9] : memref<2x1x32xf32, #tpu.memory_space<vmem>>, vector<1x1x32xf32>
    %16 = vector.shape_cast %15 : vector<1x1x32xf32> to vector<1x32xf32>
    %c0_10 = arith.constant 0 : index
    %c0_11 = arith.constant 0 : index
    %c0_12 = arith.constant 0 : index
    %17 = vector.load %arg5[%c0_10, %c0_11, %c0_12] : memref<2x1x32xf32, #tpu.memory_space<vmem>>, vector<1x1x32xf32>
    %18 = vector.shape_cast %17 : vector<1x1x32xf32> to vector<1x32xf32>
    %cst_13 = arith.constant dense<0.000000e+00> : vector<8xf32>
    %19 = vector.multi_reduction <add>, %11, %cst_13 [1] : vector<8x32xf32> to vector<8xf32>
    %20 = vector.shape_cast %19 : vector<8xf32> to vector<8x1xf32>
    %cst_14 = arith.constant 3.200000e+01 : f32
    %21 = vector.broadcast %cst_14 : f32 to vector<8x1xf32>
    %22 = arith.divf %20, %21 : vector<8x1xf32>
    %23 = vector.broadcast %22 : vector<8x1xf32> to vector<8x32xf32>
    %24 = arith.subf %11, %23 : vector<8x32xf32>
    %25 = arith.mulf %24, %24 : vector<8x32xf32>
    %cst_15 = arith.constant dense<0.000000e+00> : vector<8xf32>
    %26 = vector.multi_reduction <add>, %25, %cst_15 [1] : vector<8x32xf32> to vector<8xf32>
    %27 = vector.shape_cast %26 : vector<8xf32> to vector<8x1xf32>
    %cst_16 = arith.constant 3.200000e+01 : f32
    %28 = vector.broadcast %cst_16 : f32 to vector<8x1xf32>
    %29 = arith.divf %27, %28 : vector<8x1xf32>
    %30 = vector.broadcast %22 : vector<8x1xf32> to vector<8x32xf32>
    %31 = arith.subf %11, %30 : vector<8x32xf32>
    %cst_17 = arith.constant 9.99999974E-6 : f32
    %32 = vector.broadcast %cst_17 : f32 to vector<8x1xf32>
    %33 = arith.addf %29, %32 : vector<8x1xf32>
    %34 = math.rsqrt %33 : vector<8x1xf32>
    %35 = vector.broadcast %34 : vector<8x1xf32> to vector<8x32xf32>
    %36 = arith.mulf %31, %35 : vector<8x32xf32>
    %37 = vector.broadcast %16 : vector<1x32xf32> to vector<8x32xf32>
    %38 = arith.mulf %36, %37 : vector<8x32xf32>
    %39 = vector.broadcast %18 : vector<1x32xf32> to vector<8x32xf32>
    %40 = arith.addf %38, %39 : vector<8x32xf32>
    %41 = arith.truncf %40 : vector<8x32xf32> to vector<8x32xbf16>
    %cst_18 = arith.constant 0.000000e+00 : f32
    %42 = vector.broadcast %cst_18 : f32 to vector<8x32xf32>
    %c0_19 = arith.constant 0 : index
    %c0_20 = arith.constant 0 : index
    %c0_21 = arith.constant 0 : index
    %43 = vector.load %arg6[%c0_19, %c0_20, %c0_21] : memref<8x32x32xbf16, #tpu.memory_space<vmem>>, vector<1x32x32xbf16>
    %44 = vector.shape_cast %43 : vector<1x32x32xbf16> to vector<32x32xbf16>
    %cst_22 = arith.constant dense<0.000000e+00> : vector<8x32xf32>
    %45 = tpu.matmul %41, %44, %cst_22 {dimension_numbers = #tpu.dot_dimension_numbers<[1], [0], [0], [1], [0, 0, 1, 1], [], []>} : vector<8x32xbf16>, vector<32x32xbf16>, vector<8x32xf32> -> vector<8x32xf32>
    %46 = arith.truncf %45 : vector<8x32xf32> to vector<8x32xbf16>
    %cst_23 = arith.constant dense<0.000000e+00> : vector<8x8xf32>
    %47 = tpu.matmul %46, %41, %cst_23 {dimension_numbers = #tpu.dot_dimension_numbers<[1], [1], [0], [0], [0, 0, 1, 0], [], []>} : vector<8x32xbf16>, vector<8x32xbf16>, vector<8x8xf32> -> vector<8x8xf32>
    %cst_24 = arith.constant 0xFF800000 : f32
    %48 = vector.broadcast %cst_24 : f32 to vector<8x8xf32>
    %49 = arith.select %14, %47, %48 : vector<8x8xi1>, vector<8x8xf32>
    %cst_25 = arith.constant dense<0xFF800000> : vector<8xf32>
    %50 = vector.multi_reduction <maximumf>, %49, %cst_25 [1] : vector<8x8xf32> to vector<8xf32>
    %51 = vector.shape_cast %50 : vector<8xf32> to vector<8x1xf32>
    %52 = vector.broadcast %51 : vector<8x1xf32> to vector<8x8xf32>
    %53 = arith.subf %49, %52 : vector<8x8xf32>
    %54 = math.exp %53 : vector<8x8xf32>
    %cst_26 = arith.constant dense<0.000000e+00> : vector<8xf32>
    %55 = vector.multi_reduction <add>, %54, %cst_26 [1] : vector<8x8xf32> to vector<8xf32>
    %56 = vector.shape_cast %55 : vector<8xf32> to vector<8x1xf32>
    %57 = tpu.reciprocal %56 : vector<8x1xf32> -> vector<8x1xf32>
    %58 = vector.broadcast %57 : vector<8x1xf32> to vector<8x8xf32>
    %59 = arith.mulf %54, %58 : vector<8x8xf32>
    %c0_27 = arith.constant 0 : index
    %c0_28 = arith.constant 0 : index
    %c0_29 = arith.constant 0 : index
    %60 = vector.load %arg7[%c0_27, %c0_28, %c0_29] : memref<8x32x32xbf16, #tpu.memory_space<vmem>>, vector<1x32x32xbf16>
    %61 = vector.shape_cast %60 : vector<1x32x32xbf16> to vector<32x32xbf16>
    %cst_30 = arith.constant dense<0.000000e+00> : vector<8x32xf32>
    %62 = tpu.matmul %41, %61, %cst_30 {dimension_numbers = #tpu.dot_dimension_numbers<[1], [0], [0], [1], [0, 0, 1, 1], [], []>} : vector<8x32xbf16>, vector<32x32xbf16>, vector<8x32xf32> -> vector<8x32xf32>
    %63 = arith.truncf %59 : vector<8x8xf32> to vector<8x8xbf16>
    %64 = arith.truncf %62 : vector<8x32xf32> to vector<8x32xbf16>
    %cst_31 = arith.constant dense<0.000000e+00> : vector<8x32xf32>
    %65 = tpu.matmul %63, %64, %cst_31 {dimension_numbers = #tpu.dot_dimension_numbers<[1], [0], [0], [1], [0, 0, 1, 1], [], []>} : vector<8x8xbf16>, vector<8x32xbf16>, vector<8x32xf32> -> vector<8x32xf32>
    %66 = arith.addf %42, %65 : vector<8x32xf32>
    %c1 = arith.constant 1 : index
    %c0_32 = arith.constant 0 : index
    %c0_33 = arith.constant 0 : index
    %67 = vector.load %arg6[%c1, %c0_32, %c0_33] : memref<8x32x32xbf16, #tpu.memory_space<vmem>>, vector<1x32x32xbf16>
    %68 = vector.shape_cast %67 : vector<1x32x32xbf16> to vector<32x32xbf16>
    %cst_34 = arith.constant dense<0.000000e+00> : vector<8x32xf32>
    %69 = tpu.matmul %41, %68, %cst_34 {dimension_numbers = #tpu.dot_dimension_numbers<[1], [0], [0], [1], [0, 0, 1, 1], [], []>} : vector<8x32xbf16>, vector<32x32xbf16>, vector<8x32xf32> -> vector<8x32xf32>
    %70 = arith.truncf %69 : vector<8x32xf32> to vector<8x32xbf16>
    %cst_35 = arith.constant dense<0.000000e+00> : vector<8x8xf32>
    %71 = tpu.matmul %70, %41, %cst_35 {dimension_numbers = #tpu.dot_dimension_numbers<[1], [1], [0], [0], [0, 0, 1, 0], [], []>} : vector<8x32xbf16>, vector<8x32xbf16>, vector<8x8xf32> -> vector<8x8xf32>
    %cst_36 = arith.constant 0xFF800000 : f32
    %72 = vector.broadcast %cst_36 : f32 to vector<8x8xf32>
    %73 = arith.select %14, %71, %72 : vector<8x8xi1>, vector<8x8xf32>
    %cst_37 = arith.constant dense<0xFF800000> : vector<8xf32>
    %74 = vector.multi_reduction <maximumf>, %73, %cst_37 [1] : vector<8x8xf32> to vector<8xf32>
    %75 = vector.shape_cast %74 : vector<8xf32> to vector<8x1xf32>
    %76 = vector.broadcast %75 : vector<8x1xf32> to vector<8x8xf32>
    %77 = arith.subf %73, %76 : vector<8x8xf32>
    %78 = math.exp %77 : vector<8x8xf32>
    %cst_38 = arith.constant dense<0.000000e+00> : vector<8xf32>
    %79 = vector.multi_reduction <add>, %78, %cst_38 [1] : vector<8x8xf32> to vector<8xf32>
    %80 = vector.shape_cast %79 : vector<8xf32> to vector<8x1xf32>
    %81 = tpu.reciprocal %80 : vector<8x1xf32> -> vector<8x1xf32>
    %82 = vector.broadcast %81 : vector<8x1xf32> to vector<8x8xf32>
    %83 = arith.mulf %78, %82 : vector<8x8xf32>
    %c1_39 = arith.constant 1 : index
    %c0_40 = arith.constant 0 : index
    %c0_41 = arith.constant 0 : index
    %84 = vector.load %arg7[%c1_39, %c0_40, %c0_41] : memref<8x32x32xbf16, #tpu.memory_space<vmem>>, vector<1x32x32xbf16>
    %85 = vector.shape_cast %84 : vector<1x32x32xbf16> to vector<32x32xbf16>
    %cst_42 = arith.constant dense<0.000000e+00> : vector<8x32xf32>
    %86 = tpu.matmul %41, %85, %cst_42 {dimension_numbers = #tpu.dot_dimension_numbers<[1], [0], [0], [1], [0, 0, 1, 1], [], []>} : vector<8x32xbf16>, vector<32x32xbf16>, vector<8x32xf32> -> vector<8x32xf32>
    %87 = arith.truncf %83 : vector<8x8xf32> to vector<8x8xbf16>
    %88 = arith.truncf %86 : vector<8x32xf32> to vector<8x32xbf16>
    %cst_43 = arith.constant dense<0.000000e+00> : vector<8x32xf32>
    %89 = tpu.matmul %87, %88, %cst_43 {dimension_numbers = #tpu.dot_dimension_numbers<[1], [0], [0], [1], [0, 0, 1, 1], [], []>} : vector<8x8xbf16>, vector<8x32xbf16>, vector<8x32xf32> -> vector<8x32xf32>
    %90 = arith.addf %66, %89 : vector<8x32xf32>
    %c2 = arith.constant 2 : index
    %c0_44 = arith.constant 0 : index
    %c0_45 = arith.constant 0 : index
    %91 = vector.load %arg6[%c2, %c0_44, %c0_45] : memref<8x32x32xbf16, #tpu.memory_space<vmem>>, vector<1x32x32xbf16>
    %92 = vector.shape_cast %91 : vector<1x32x32xbf16> to vector<32x32xbf16>
    %cst_46 = arith.constant dense<0.000000e+00> : vector<8x32xf32>
    %93 = tpu.matmul %41, %92, %cst_46 {dimension_numbers = #tpu.dot_dimension_numbers<[1], [0], [0], [1], [0, 0, 1, 1], [], []>} : vector<8x32xbf16>, vector<32x32xbf16>, vector<8x32xf32> -> vector<8x32xf32>
    %94 = arith.truncf %93 : vector<8x32xf32> to vector<8x32xbf16>
    %cst_47 = arith.constant dense<0.000000e+00> : vector<8x8xf32>
    %95 = tpu.matmul %94, %41, %cst_47 {dimension_numbers = #tpu.dot_dimension_numbers<[1], [1], [0], [0], [0, 0, 1, 0], [], []>} : vector<8x32xbf16>, vector<8x32xbf16>, vector<8x8xf32> -> vector<8x8xf32>
    %cst_48 = arith.constant 0xFF800000 : f32
    %96 = vector.broadcast %cst_48 : f32 to vector<8x8xf32>
    %97 = arith.select %14, %95, %96 : vector<8x8xi1>, vector<8x8xf32>
    %cst_49 = arith.constant dense<0xFF800000> : vector<8xf32>
    %98 = vector.multi_reduction <maximumf>, %97, %cst_49 [1] : vector<8x8xf32> to vector<8xf32>
    %99 = vector.shape_cast %98 : vector<8xf32> to vector<8x1xf32>
    %100 = vector.broadcast %99 : vector<8x1xf32> to vector<8x8xf32>
    %101 = arith.subf %97, %100 : vector<8x8xf32>
    %102 = math.exp %101 : vector<8x8xf32>
    %cst_50 = arith.constant dense<0.000000e+00> : vector<8xf32>
    %103 = vector.multi_reduction <add>, %102, %cst_50 [1] : vector<8x8xf32> to vector<8xf32>
    %104 = vector.shape_cast %103 : vector<8xf32> to vector<8x1xf32>
    %105 = tpu.reciprocal %104 : vector<8x1xf32> -> vector<8x1xf32>
    %106 = vector.broadcast %105 : vector<8x1xf32> to vector<8x8xf32>
    %107 = arith.mulf %102, %106 : vector<8x8xf32>
    %c2_51 = arith.constant 2 : index
    %c0_52 = arith.constant 0 : index
    %c0_53 = arith.constant 0 : index
    %108 = vector.load %arg7[%c2_51, %c0_52, %c0_53] : memref<8x32x32xbf16, #tpu.memory_space<vmem>>, vector<1x32x32xbf16>
    %109 = vector.shape_cast %108 : vector<1x32x32xbf16> to vector<32x32xbf16>
    %cst_54 = arith.constant dense<0.000000e+00> : vector<8x32xf32>
    %110 = tpu.matmul %41, %109, %cst_54 {dimension_numbers = #tpu.dot_dimension_numbers<[1], [0], [0], [1], [0, 0, 1, 1], [], []>} : vector<8x32xbf16>, vector<32x32xbf16>, vector<8x32xf32> -> vector<8x32xf32>
    %111 = arith.truncf %107 : vector<8x8xf32> to vector<8x8xbf16>
    %112 = arith.truncf %110 : vector<8x32xf32> to vector<8x32xbf16>
    %cst_55 = arith.constant dense<0.000000e+00> : vector<8x32xf32>
    %113 = tpu.matmul %111, %112, %cst_55 {dimension_numbers = #tpu.dot_dimension_numbers<[1], [0], [0], [1], [0, 0, 1, 1], [], []>} : vector<8x8xbf16>, vector<8x32xbf16>, vector<8x32xf32> -> vector<8x32xf32>
    %114 = arith.addf %90, %113 : vector<8x32xf32>
    %c3 = arith.constant 3 : index
    %c0_56 = arith.constant 0 : index
    %c0_57 = arith.constant 0 : index
    %115 = vector.load %arg6[%c3, %c0_56, %c0_57] : memref<8x32x32xbf16, #tpu.memory_space<vmem>>, vector<1x32x32xbf16>
    %116 = vector.shape_cast %115 : vector<1x32x32xbf16> to vector<32x32xbf16>
    %cst_58 = arith.constant dense<0.000000e+00> : vector<8x32xf32>
    %117 = tpu.matmul %41, %116, %cst_58 {dimension_numbers = #tpu.dot_dimension_numbers<[1], [0], [0], [1], [0, 0, 1, 1], [], []>} : vector<8x32xbf16>, vector<32x32xbf16>, vector<8x32xf32> -> vector<8x32xf32>
    %118 = arith.truncf %117 : vector<8x32xf32> to vector<8x32xbf16>
    %cst_59 = arith.constant dense<0.000000e+00> : vector<8x8xf32>
    %119 = tpu.matmul %118, %41, %cst_59 {dimension_numbers = #tpu.dot_dimension_numbers<[1], [1], [0], [0], [0, 0, 1, 0], [], []>} : vector<8x32xbf16>, vector<8x32xbf16>, vector<8x8xf32> -> vector<8x8xf32>
    %cst_60 = arith.constant 0xFF800000 : f32
    %120 = vector.broadcast %cst_60 : f32 to vector<8x8xf32>
    %121 = arith.select %14, %119, %120 : vector<8x8xi1>, vector<8x8xf32>
    %cst_61 = arith.constant dense<0xFF800000> : vector<8xf32>
    %122 = vector.multi_reduction <maximumf>, %121, %cst_61 [1] : vector<8x8xf32> to vector<8xf32>
    %123 = vector.shape_cast %122 : vector<8xf32> to vector<8x1xf32>
    %124 = vector.broadcast %123 : vector<8x1xf32> to vector<8x8xf32>
    %125 = arith.subf %121, %124 : vector<8x8xf32>
    %126 = math.exp %125 : vector<8x8xf32>
    %cst_62 = arith.constant dense<0.000000e+00> : vector<8xf32>
    %127 = vector.multi_reduction <add>, %126, %cst_62 [1] : vector<8x8xf32> to vector<8xf32>
    %128 = vector.shape_cast %127 : vector<8xf32> to vector<8x1xf32>
    %129 = tpu.reciprocal %128 : vector<8x1xf32> -> vector<8x1xf32>
    %130 = vector.broadcast %129 : vector<8x1xf32> to vector<8x8xf32>
    %131 = arith.mulf %126, %130 : vector<8x8xf32>
    %c3_63 = arith.constant 3 : index
    %c0_64 = arith.constant 0 : index
    %c0_65 = arith.constant 0 : index
    %132 = vector.load %arg7[%c3_63, %c0_64, %c0_65] : memref<8x32x32xbf16, #tpu.memory_space<vmem>>, vector<1x32x32xbf16>
    %133 = vector.shape_cast %132 : vector<1x32x32xbf16> to vector<32x32xbf16>
    %cst_66 = arith.constant dense<0.000000e+00> : vector<8x32xf32>
    %134 = tpu.matmul %41, %133, %cst_66 {dimension_numbers = #tpu.dot_dimension_numbers<[1], [0], [0], [1], [0, 0, 1, 1], [], []>} : vector<8x32xbf16>, vector<32x32xbf16>, vector<8x32xf32> -> vector<8x32xf32>
    %135 = arith.truncf %131 : vector<8x8xf32> to vector<8x8xbf16>
    %136 = arith.truncf %134 : vector<8x32xf32> to vector<8x32xbf16>
    %cst_67 = arith.constant dense<0.000000e+00> : vector<8x32xf32>
    %137 = tpu.matmul %135, %136, %cst_67 {dimension_numbers = #tpu.dot_dimension_numbers<[1], [0], [0], [1], [0, 0, 1, 1], [], []>} : vector<8x8xbf16>, vector<8x32xbf16>, vector<8x32xf32> -> vector<8x32xf32>
    %138 = arith.addf %114, %137 : vector<8x32xf32>
    %139 = arith.addf %11, %138 : vector<8x32xf32>
    %c0_68 = arith.constant 0 : index
    %c0_69 = arith.constant 0 : index
    %c0_70 = arith.constant 0 : index
    %140 = vector.load %arg8[%c0_68, %c0_69, %c0_70] : memref<2x1x32xf32, #tpu.memory_space<vmem>>, vector<1x1x32xf32>
    %141 = vector.shape_cast %140 : vector<1x1x32xf32> to vector<1x32xf32>
    %142 = vector.broadcast %141 : vector<1x32xf32> to vector<8x32xf32>
    %143 = arith.addf %139, %142 : vector<8x32xf32>
    %c0_71 = arith.constant 0 : index
    %c0_72 = arith.constant 0 : index
    %c0_73 = arith.constant 0 : index
    %144 = vector.load %arg9[%c0_71, %c0_72, %c0_73] : memref<2x1x32xf32, #tpu.memory_space<vmem>>, vector<1x1x32xf32>
    %145 = vector.shape_cast %144 : vector<1x1x32xf32> to vector<1x32xf32>
    %c0_74 = arith.constant 0 : index
    %c0_75 = arith.constant 0 : index
    %c0_76 = arith.constant 0 : index
    %146 = vector.load %arg10[%c0_74, %c0_75, %c0_76] : memref<2x1x32xf32, #tpu.memory_space<vmem>>, vector<1x1x32xf32>
    %147 = vector.shape_cast %146 : vector<1x1x32xf32> to vector<1x32xf32>
    %cst_77 = arith.constant dense<0.000000e+00> : vector<8xf32>
    %148 = vector.multi_reduction <add>, %143, %cst_77 [1] : vector<8x32xf32> to vector<8xf32>
    %149 = vector.shape_cast %148 : vector<8xf32> to vector<8x1xf32>
    %cst_78 = arith.constant 3.200000e+01 : f32
    %150 = vector.broadcast %cst_78 : f32 to vector<8x1xf32>
    %151 = arith.divf %149, %150 : vector<8x1xf32>
    %152 = vector.broadcast %151 : vector<8x1xf32> to vector<8x32xf32>
    %153 = arith.subf %143, %152 : vector<8x32xf32>
    %154 = arith.mulf %153, %153 : vector<8x32xf32>
    %cst_79 = arith.constant dense<0.000000e+00> : vector<8xf32>
    %155 = vector.multi_reduction <add>, %154, %cst_79 [1] : vector<8x32xf32> to vector<8xf32>
    %156 = vector.shape_cast %155 : vector<8xf32> to vector<8x1xf32>
    %cst_80 = arith.constant 3.200000e+01 : f32
    %157 = vector.broadcast %cst_80 : f32 to vector<8x1xf32>
    %158 = arith.divf %156, %157 : vector<8x1xf32>
    %159 = vector.broadcast %151 : vector<8x1xf32> to vector<8x32xf32>
    %160 = arith.subf %143, %159 : vector<8x32xf32>
    %cst_81 = arith.constant 9.99999974E-6 : f32
    %161 = vector.broadcast %cst_81 : f32 to vector<8x1xf32>
    %162 = arith.addf %158, %161 : vector<8x1xf32>
    %163 = math.rsqrt %162 : vector<8x1xf32>
    %164 = vector.broadcast %163 : vector<8x1xf32> to vector<8x32xf32>
    %165 = arith.mulf %160, %164 : vector<8x32xf32>
    %166 = vector.broadcast %145 : vector<1x32xf32> to vector<8x32xf32>
    %167 = arith.mulf %165, %166 : vector<8x32xf32>
    %168 = vector.broadcast %147 : vector<1x32xf32> to vector<8x32xf32>
    %169 = arith.addf %167, %168 : vector<8x32xf32>
    %170 = arith.truncf %169 : vector<8x32xf32> to vector<8x32xbf16>
    %c0_82 = arith.constant 0 : index
    %c0_83 = arith.constant 0 : index
    %c0_84 = arith.constant 0 : index
    %171 = vector.load %arg11[%c0_82, %c0_83, %c0_84] : memref<2x32x128xbf16, #tpu.memory_space<vmem>>, vector<1x32x128xbf16>
    %172 = vector.shape_cast %171 : vector<1x32x128xbf16> to vector<32x128xbf16>
    %cst_85 = arith.constant dense<0.000000e+00> : vector<8x128xf32>
    %173 = tpu.matmul %170, %172, %cst_85 {dimension_numbers = #tpu.dot_dimension_numbers<[1], [0], [0], [1], [0, 0, 1, 1], [], []>} : vector<8x32xbf16>, vector<32x128xbf16>, vector<8x128xf32> -> vector<8x128xf32>
    %c0_86 = arith.constant 0 : index
    %c0_87 = arith.constant 0 : index
    %c0_88 = arith.constant 0 : index
    %174 = vector.load %arg12[%c0_86, %c0_87, %c0_88] : memref<2x1x128xf32, #tpu.memory_space<vmem>>, vector<1x1x128xf32>
    %175 = vector.shape_cast %174 : vector<1x1x128xf32> to vector<1x128xf32>
    %176 = vector.broadcast %175 : vector<1x128xf32> to vector<8x128xf32>
    %177 = arith.addf %173, %176 : vector<8x128xf32>
    %cst_89 = arith.constant 0.000000e+00 : f32
    %178 = vector.broadcast %cst_89 : f32 to vector<8x128xf32>
    %179 = arith.maximumf %177, %178 : vector<8x128xf32>
    %180 = arith.truncf %179 : vector<8x128xf32> to vector<8x128xbf16>
    %c0_90 = arith.constant 0 : index
    %c0_91 = arith.constant 0 : index
    %c0_92 = arith.constant 0 : index
    %181 = vector.load %arg13[%c0_90, %c0_91, %c0_92] : memref<2x128x32xbf16, #tpu.memory_space<vmem>>, vector<1x128x32xbf16>
    %182 = vector.shape_cast %181 : vector<1x128x32xbf16> to vector<128x32xbf16>
    %cst_93 = arith.constant dense<0.000000e+00> : vector<8x32xf32>
    %183 = tpu.matmul %180, %182, %cst_93 {dimension_numbers = #tpu.dot_dimension_numbers<[1], [0], [0], [1], [0, 0, 1, 1], [], []>} : vector<8x128xbf16>, vector<128x32xbf16>, vector<8x32xf32> -> vector<8x32xf32>
    %184 = arith.addf %143, %183 : vector<8x32xf32>
    %c0_94 = arith.constant 0 : index
    %c0_95 = arith.constant 0 : index
    %c0_96 = arith.constant 0 : index
    %185 = vector.load %arg14[%c0_94, %c0_95, %c0_96] : memref<2x1x32xf32, #tpu.memory_space<vmem>>, vector<1x1x32xf32>
    %186 = vector.shape_cast %185 : vector<1x1x32xf32> to vector<1x32xf32>
    %187 = vector.broadcast %186 : vector<1x32xf32> to vector<8x32xf32>
    %188 = arith.addf %184, %187 : vector<8x32xf32>
    %c1_97 = arith.constant 1 : index
    %c0_98 = arith.constant 0 : index
    %c0_99 = arith.constant 0 : index
    %189 = vector.load %arg4[%c1_97, %c0_98, %c0_99] : memref<2x1x32xf32, #tpu.memory_space<vmem>>, vector<1x1x32xf32>
    %190 = vector.shape_cast %189 : vector<1x1x32xf32> to vector<1x32xf32>
    %c1_100 = arith.constant 1 : index
    %c0_101 = arith.constant 0 : index
    %c0_102 = arith.constant 0 : index
    %191 = vector.load %arg5[%c1_100, %c0_101, %c0_102] : memref<2x1x32xf32, #tpu.memory_space<vmem>>, vector<1x1x32xf32>
    %192 = vector.shape_cast %191 : vector<1x1x32xf32> to vector<1x32xf32>
    %cst_103 = arith.constant dense<0.000000e+00> : vector<8xf32>
    %193 = vector.multi_reduction <add>, %188, %cst_103 [1] : vector<8x32xf32> to vector<8xf32>
    %194 = vector.shape_cast %193 : vector<8xf32> to vector<8x1xf32>
    %cst_104 = arith.constant 3.200000e+01 : f32
    %195 = vector.broadcast %cst_104 : f32 to vector<8x1xf32>
    %196 = arith.divf %194, %195 : vector<8x1xf32>
    %197 = vector.broadcast %196 : vector<8x1xf32> to vector<8x32xf32>
    %198 = arith.subf %188, %197 : vector<8x32xf32>
    %199 = arith.mulf %198, %198 : vector<8x32xf32>
    %cst_105 = arith.constant dense<0.000000e+00> : vector<8xf32>
    %200 = vector.multi_reduction <add>, %199, %cst_105 [1] : vector<8x32xf32> to vector<8xf32>
    %201 = vector.shape_cast %200 : vector<8xf32> to vector<8x1xf32>
    %cst_106 = arith.constant 3.200000e+01 : f32
    %202 = vector.broadcast %cst_106 : f32 to vector<8x1xf32>
    %203 = arith.divf %201, %202 : vector<8x1xf32>
    %204 = vector.broadcast %196 : vector<8x1xf32> to vector<8x32xf32>
    %205 = arith.subf %188, %204 : vector<8x32xf32>
    %cst_107 = arith.constant 9.99999974E-6 : f32
    %206 = vector.broadcast %cst_107 : f32 to vector<8x1xf32>
    %207 = arith.addf %203, %206 : vector<8x1xf32>
    %208 = math.rsqrt %207 : vector<8x1xf32>
    %209 = vector.broadcast %208 : vector<8x1xf32> to vector<8x32xf32>
    %210 = arith.mulf %205, %209 : vector<8x32xf32>
    %211 = vector.broadcast %190 : vector<1x32xf32> to vector<8x32xf32>
    %212 = arith.mulf %210, %211 : vector<8x32xf32>
    %213 = vector.broadcast %192 : vector<1x32xf32> to vector<8x32xf32>
    %214 = arith.addf %212, %213 : vector<8x32xf32>
    %215 = arith.truncf %214 : vector<8x32xf32> to vector<8x32xbf16>
    %cst_108 = arith.constant 0.000000e+00 : f32
    %216 = vector.broadcast %cst_108 : f32 to vector<8x32xf32>
    %c4 = arith.constant 4 : index
    %c0_109 = arith.constant 0 : index
    %c0_110 = arith.constant 0 : index
    %217 = vector.load %arg6[%c4, %c0_109, %c0_110] : memref<8x32x32xbf16, #tpu.memory_space<vmem>>, vector<1x32x32xbf16>
    %218 = vector.shape_cast %217 : vector<1x32x32xbf16> to vector<32x32xbf16>
    %cst_111 = arith.constant dense<0.000000e+00> : vector<8x32xf32>
    %219 = tpu.matmul %215, %218, %cst_111 {dimension_numbers = #tpu.dot_dimension_numbers<[1], [0], [0], [1], [0, 0, 1, 1], [], []>} : vector<8x32xbf16>, vector<32x32xbf16>, vector<8x32xf32> -> vector<8x32xf32>
    %220 = arith.truncf %219 : vector<8x32xf32> to vector<8x32xbf16>
    %cst_112 = arith.constant dense<0.000000e+00> : vector<8x8xf32>
    %221 = tpu.matmul %220, %215, %cst_112 {dimension_numbers = #tpu.dot_dimension_numbers<[1], [1], [0], [0], [0, 0, 1, 0], [], []>} : vector<8x32xbf16>, vector<8x32xbf16>, vector<8x8xf32> -> vector<8x8xf32>
    %cst_113 = arith.constant 0xFF800000 : f32
    %222 = vector.broadcast %cst_113 : f32 to vector<8x8xf32>
    %223 = arith.select %14, %221, %222 : vector<8x8xi1>, vector<8x8xf32>
    %cst_114 = arith.constant dense<0xFF800000> : vector<8xf32>
    %224 = vector.multi_reduction <maximumf>, %223, %cst_114 [1] : vector<8x8xf32> to vector<8xf32>
    %225 = vector.shape_cast %224 : vector<8xf32> to vector<8x1xf32>
    %226 = vector.broadcast %225 : vector<8x1xf32> to vector<8x8xf32>
    %227 = arith.subf %223, %226 : vector<8x8xf32>
    %228 = math.exp %227 : vector<8x8xf32>
    %cst_115 = arith.constant dense<0.000000e+00> : vector<8xf32>
    %229 = vector.multi_reduction <add>, %228, %cst_115 [1] : vector<8x8xf32> to vector<8xf32>
    %230 = vector.shape_cast %229 : vector<8xf32> to vector<8x1xf32>
    %231 = tpu.reciprocal %230 : vector<8x1xf32> -> vector<8x1xf32>
    %232 = vector.broadcast %231 : vector<8x1xf32> to vector<8x8xf32>
    %233 = arith.mulf %228, %232 : vector<8x8xf32>
    %c4_116 = arith.constant 4 : index
    %c0_117 = arith.constant 0 : index
    %c0_118 = arith.constant 0 : index
    %234 = vector.load %arg7[%c4_116, %c0_117, %c0_118] : memref<8x32x32xbf16, #tpu.memory_space<vmem>>, vector<1x32x32xbf16>
    %235 = vector.shape_cast %234 : vector<1x32x32xbf16> to vector<32x32xbf16>
    %cst_119 = arith.constant dense<0.000000e+00> : vector<8x32xf32>
    %236 = tpu.matmul %215, %235, %cst_119 {dimension_numbers = #tpu.dot_dimension_numbers<[1], [0], [0], [1], [0, 0, 1, 1], [], []>} : vector<8x32xbf16>, vector<32x32xbf16>, vector<8x32xf32> -> vector<8x32xf32>
    %237 = arith.truncf %233 : vector<8x8xf32> to vector<8x8xbf16>
    %238 = arith.truncf %236 : vector<8x32xf32> to vector<8x32xbf16>
    %cst_120 = arith.constant dense<0.000000e+00> : vector<8x32xf32>
    %239 = tpu.matmul %237, %238, %cst_120 {dimension_numbers = #tpu.dot_dimension_numbers<[1], [0], [0], [1], [0, 0, 1, 1], [], []>} : vector<8x8xbf16>, vector<8x32xbf16>, vector<8x32xf32> -> vector<8x32xf32>
    %240 = arith.addf %216, %239 : vector<8x32xf32>
    %c5 = arith.constant 5 : index
    %c0_121 = arith.constant 0 : index
    %c0_122 = arith.constant 0 : index
    %241 = vector.load %arg6[%c5, %c0_121, %c0_122] : memref<8x32x32xbf16, #tpu.memory_space<vmem>>, vector<1x32x32xbf16>
    %242 = vector.shape_cast %241 : vector<1x32x32xbf16> to vector<32x32xbf16>
    %cst_123 = arith.constant dense<0.000000e+00> : vector<8x32xf32>
    %243 = tpu.matmul %215, %242, %cst_123 {dimension_numbers = #tpu.dot_dimension_numbers<[1], [0], [0], [1], [0, 0, 1, 1], [], []>} : vector<8x32xbf16>, vector<32x32xbf16>, vector<8x32xf32> -> vector<8x32xf32>
    %244 = arith.truncf %243 : vector<8x32xf32> to vector<8x32xbf16>
    %cst_124 = arith.constant dense<0.000000e+00> : vector<8x8xf32>
    %245 = tpu.matmul %244, %215, %cst_124 {dimension_numbers = #tpu.dot_dimension_numbers<[1], [1], [0], [0], [0, 0, 1, 0], [], []>} : vector<8x32xbf16>, vector<8x32xbf16>, vector<8x8xf32> -> vector<8x8xf32>
    %cst_125 = arith.constant 0xFF800000 : f32
    %246 = vector.broadcast %cst_125 : f32 to vector<8x8xf32>
    %247 = arith.select %14, %245, %246 : vector<8x8xi1>, vector<8x8xf32>
    %cst_126 = arith.constant dense<0xFF800000> : vector<8xf32>
    %248 = vector.multi_reduction <maximumf>, %247, %cst_126 [1] : vector<8x8xf32> to vector<8xf32>
    %249 = vector.shape_cast %248 : vector<8xf32> to vector<8x1xf32>
    %250 = vector.broadcast %249 : vector<8x1xf32> to vector<8x8xf32>
    %251 = arith.subf %247, %250 : vector<8x8xf32>
    %252 = math.exp %251 : vector<8x8xf32>
    %cst_127 = arith.constant dense<0.000000e+00> : vector<8xf32>
    %253 = vector.multi_reduction <add>, %252, %cst_127 [1] : vector<8x8xf32> to vector<8xf32>
    %254 = vector.shape_cast %253 : vector<8xf32> to vector<8x1xf32>
    %255 = tpu.reciprocal %254 : vector<8x1xf32> -> vector<8x1xf32>
    %256 = vector.broadcast %255 : vector<8x1xf32> to vector<8x8xf32>
    %257 = arith.mulf %252, %256 : vector<8x8xf32>
    %c5_128 = arith.constant 5 : index
    %c0_129 = arith.constant 0 : index
    %c0_130 = arith.constant 0 : index
    %258 = vector.load %arg7[%c5_128, %c0_129, %c0_130] : memref<8x32x32xbf16, #tpu.memory_space<vmem>>, vector<1x32x32xbf16>
    %259 = vector.shape_cast %258 : vector<1x32x32xbf16> to vector<32x32xbf16>
    %cst_131 = arith.constant dense<0.000000e+00> : vector<8x32xf32>
    %260 = tpu.matmul %215, %259, %cst_131 {dimension_numbers = #tpu.dot_dimension_numbers<[1], [0], [0], [1], [0, 0, 1, 1], [], []>} : vector<8x32xbf16>, vector<32x32xbf16>, vector<8x32xf32> -> vector<8x32xf32>
    %261 = arith.truncf %257 : vector<8x8xf32> to vector<8x8xbf16>
    %262 = arith.truncf %260 : vector<8x32xf32> to vector<8x32xbf16>
    %cst_132 = arith.constant dense<0.000000e+00> : vector<8x32xf32>
    %263 = tpu.matmul %261, %262, %cst_132 {dimension_numbers = #tpu.dot_dimension_numbers<[1], [0], [0], [1], [0, 0, 1, 1], [], []>} : vector<8x8xbf16>, vector<8x32xbf16>, vector<8x32xf32> -> vector<8x32xf32>
    %264 = arith.addf %240, %263 : vector<8x32xf32>
    %c6 = arith.constant 6 : index
    %c0_133 = arith.constant 0 : index
    %c0_134 = arith.constant 0 : index
    %265 = vector.load %arg6[%c6, %c0_133, %c0_134] : memref<8x32x32xbf16, #tpu.memory_space<vmem>>, vector<1x32x32xbf16>
    %266 = vector.shape_cast %265 : vector<1x32x32xbf16> to vector<32x32xbf16>
    %cst_135 = arith.constant dense<0.000000e+00> : vector<8x32xf32>
    %267 = tpu.matmul %215, %266, %cst_135 {dimension_numbers = #tpu.dot_dimension_numbers<[1], [0], [0], [1], [0, 0, 1, 1], [], []>} : vector<8x32xbf16>, vector<32x32xbf16>, vector<8x32xf32> -> vector<8x32xf32>
    %268 = arith.truncf %267 : vector<8x32xf32> to vector<8x32xbf16>
    %cst_136 = arith.constant dense<0.000000e+00> : vector<8x8xf32>
    %269 = tpu.matmul %268, %215, %cst_136 {dimension_numbers = #tpu.dot_dimension_numbers<[1], [1], [0], [0], [0, 0, 1, 0], [], []>} : vector<8x32xbf16>, vector<8x32xbf16>, vector<8x8xf32> -> vector<8x8xf32>
    %cst_137 = arith.constant 0xFF800000 : f32
    %270 = vector.broadcast %cst_137 : f32 to vector<8x8xf32>
    %271 = arith.select %14, %269, %270 : vector<8x8xi1>, vector<8x8xf32>
    %cst_138 = arith.constant dense<0xFF800000> : vector<8xf32>
    %272 = vector.multi_reduction <maximumf>, %271, %cst_138 [1] : vector<8x8xf32> to vector<8xf32>
    %273 = vector.shape_cast %272 : vector<8xf32> to vector<8x1xf32>
    %274 = vector.broadcast %273 : vector<8x1xf32> to vector<8x8xf32>
    %275 = arith.subf %271, %274 : vector<8x8xf32>
    %276 = math.exp %275 : vector<8x8xf32>
    %cst_139 = arith.constant dense<0.000000e+00> : vector<8xf32>
    %277 = vector.multi_reduction <add>, %276, %cst_139 [1] : vector<8x8xf32> to vector<8xf32>
    %278 = vector.shape_cast %277 : vector<8xf32> to vector<8x1xf32>
    %279 = tpu.reciprocal %278 : vector<8x1xf32> -> vector<8x1xf32>
    %280 = vector.broadcast %279 : vector<8x1xf32> to vector<8x8xf32>
    %281 = arith.mulf %276, %280 : vector<8x8xf32>
    %c6_140 = arith.constant 6 : index
    %c0_141 = arith.constant 0 : index
    %c0_142 = arith.constant 0 : index
    %282 = vector.load %arg7[%c6_140, %c0_141, %c0_142] : memref<8x32x32xbf16, #tpu.memory_space<vmem>>, vector<1x32x32xbf16>
    %283 = vector.shape_cast %282 : vector<1x32x32xbf16> to vector<32x32xbf16>
    %cst_143 = arith.constant dense<0.000000e+00> : vector<8x32xf32>
    %284 = tpu.matmul %215, %283, %cst_143 {dimension_numbers = #tpu.dot_dimension_numbers<[1], [0], [0], [1], [0, 0, 1, 1], [], []>} : vector<8x32xbf16>, vector<32x32xbf16>, vector<8x32xf32> -> vector<8x32xf32>
    %285 = arith.truncf %281 : vector<8x8xf32> to vector<8x8xbf16>
    %286 = arith.truncf %284 : vector<8x32xf32> to vector<8x32xbf16>
    %cst_144 = arith.constant dense<0.000000e+00> : vector<8x32xf32>
    %287 = tpu.matmul %285, %286, %cst_144 {dimension_numbers = #tpu.dot_dimension_numbers<[1], [0], [0], [1], [0, 0, 1, 1], [], []>} : vector<8x8xbf16>, vector<8x32xbf16>, vector<8x32xf32> -> vector<8x32xf32>
    %288 = arith.addf %264, %287 : vector<8x32xf32>
    %c7 = arith.constant 7 : index
    %c0_145 = arith.constant 0 : index
    %c0_146 = arith.constant 0 : index
    %289 = vector.load %arg6[%c7, %c0_145, %c0_146] : memref<8x32x32xbf16, #tpu.memory_space<vmem>>, vector<1x32x32xbf16>
    %290 = vector.shape_cast %289 : vector<1x32x32xbf16> to vector<32x32xbf16>
    %cst_147 = arith.constant dense<0.000000e+00> : vector<8x32xf32>
    %291 = tpu.matmul %215, %290, %cst_147 {dimension_numbers = #tpu.dot_dimension_numbers<[1], [0], [0], [1], [0, 0, 1, 1], [], []>} : vector<8x32xbf16>, vector<32x32xbf16>, vector<8x32xf32> -> vector<8x32xf32>
    %292 = arith.truncf %291 : vector<8x32xf32> to vector<8x32xbf16>
    %cst_148 = arith.constant dense<0.000000e+00> : vector<8x8xf32>
    %293 = tpu.matmul %292, %215, %cst_148 {dimension_numbers = #tpu.dot_dimension_numbers<[1], [1], [0], [0], [0, 0, 1, 0], [], []>} : vector<8x32xbf16>, vector<8x32xbf16>, vector<8x8xf32> -> vector<8x8xf32>
    %cst_149 = arith.constant 0xFF800000 : f32
    %294 = vector.broadcast %cst_149 : f32 to vector<8x8xf32>
    %295 = arith.select %14, %293, %294 : vector<8x8xi1>, vector<8x8xf32>
    %cst_150 = arith.constant dense<0xFF800000> : vector<8xf32>
    %296 = vector.multi_reduction <maximumf>, %295, %cst_150 [1] : vector<8x8xf32> to vector<8xf32>
    %297 = vector.shape_cast %296 : vector<8xf32> to vector<8x1xf32>
    %298 = vector.broadcast %297 : vector<8x1xf32> to vector<8x8xf32>
    %299 = arith.subf %295, %298 : vector<8x8xf32>
    %300 = math.exp %299 : vector<8x8xf32>
    %cst_151 = arith.constant dense<0.000000e+00> : vector<8xf32>
    %301 = vector.multi_reduction <add>, %300, %cst_151 [1] : vector<8x8xf32> to vector<8xf32>
    %302 = vector.shape_cast %301 : vector<8xf32> to vector<8x1xf32>
    %303 = tpu.reciprocal %302 : vector<8x1xf32> -> vector<8x1xf32>
    %304 = vector.broadcast %303 : vector<8x1xf32> to vector<8x8xf32>
    %305 = arith.mulf %300, %304 : vector<8x8xf32>
    %c7_152 = arith.constant 7 : index
    %c0_153 = arith.constant 0 : index
    %c0_154 = arith.constant 0 : index
    %306 = vector.load %arg7[%c7_152, %c0_153, %c0_154] : memref<8x32x32xbf16, #tpu.memory_space<vmem>>, vector<1x32x32xbf16>
    %307 = vector.shape_cast %306 : vector<1x32x32xbf16> to vector<32x32xbf16>
    %cst_155 = arith.constant dense<0.000000e+00> : vector<8x32xf32>
    %308 = tpu.matmul %215, %307, %cst_155 {dimension_numbers = #tpu.dot_dimension_numbers<[1], [0], [0], [1], [0, 0, 1, 1], [], []>} : vector<8x32xbf16>, vector<32x32xbf16>, vector<8x32xf32> -> vector<8x32xf32>
    %309 = arith.truncf %305 : vector<8x8xf32> to vector<8x8xbf16>
    %310 = arith.truncf %308 : vector<8x32xf32> to vector<8x32xbf16>
    %cst_156 = arith.constant dense<0.000000e+00> : vector<8x32xf32>
    %311 = tpu.matmul %309, %310, %cst_156 {dimension_numbers = #tpu.dot_dimension_numbers<[1], [0], [0], [1], [0, 0, 1, 1], [], []>} : vector<8x8xbf16>, vector<8x32xbf16>, vector<8x32xf32> -> vector<8x32xf32>
    %312 = arith.addf %288, %311 : vector<8x32xf32>
    %313 = arith.addf %188, %312 : vector<8x32xf32>
    %c1_157 = arith.constant 1 : index
    %c0_158 = arith.constant 0 : index
    %c0_159 = arith.constant 0 : index
    %314 = vector.load %arg8[%c1_157, %c0_158, %c0_159] : memref<2x1x32xf32, #tpu.memory_space<vmem>>, vector<1x1x32xf32>
    %315 = vector.shape_cast %314 : vector<1x1x32xf32> to vector<1x32xf32>
    %316 = vector.broadcast %315 : vector<1x32xf32> to vector<8x32xf32>
    %317 = arith.addf %313, %316 : vector<8x32xf32>
    %c1_160 = arith.constant 1 : index
    %c0_161 = arith.constant 0 : index
    %c0_162 = arith.constant 0 : index
    %318 = vector.load %arg9[%c1_160, %c0_161, %c0_162] : memref<2x1x32xf32, #tpu.memory_space<vmem>>, vector<1x1x32xf32>
    %319 = vector.shape_cast %318 : vector<1x1x32xf32> to vector<1x32xf32>
    %c1_163 = arith.constant 1 : index
    %c0_164 = arith.constant 0 : index
    %c0_165 = arith.constant 0 : index
    %320 = vector.load %arg10[%c1_163, %c0_164, %c0_165] : memref<2x1x32xf32, #tpu.memory_space<vmem>>, vector<1x1x32xf32>
    %321 = vector.shape_cast %320 : vector<1x1x32xf32> to vector<1x32xf32>
    %cst_166 = arith.constant dense<0.000000e+00> : vector<8xf32>
    %322 = vector.multi_reduction <add>, %317, %cst_166 [1] : vector<8x32xf32> to vector<8xf32>
    %323 = vector.shape_cast %322 : vector<8xf32> to vector<8x1xf32>
    %cst_167 = arith.constant 3.200000e+01 : f32
    %324 = vector.broadcast %cst_167 : f32 to vector<8x1xf32>
    %325 = arith.divf %323, %324 : vector<8x1xf32>
    %326 = vector.broadcast %325 : vector<8x1xf32> to vector<8x32xf32>
    %327 = arith.subf %317, %326 : vector<8x32xf32>
    %328 = arith.mulf %327, %327 : vector<8x32xf32>
    %cst_168 = arith.constant dense<0.000000e+00> : vector<8xf32>
    %329 = vector.multi_reduction <add>, %328, %cst_168 [1] : vector<8x32xf32> to vector<8xf32>
    %330 = vector.shape_cast %329 : vector<8xf32> to vector<8x1xf32>
    %cst_169 = arith.constant 3.200000e+01 : f32
    %331 = vector.broadcast %cst_169 : f32 to vector<8x1xf32>
    %332 = arith.divf %330, %331 : vector<8x1xf32>
    %333 = vector.broadcast %325 : vector<8x1xf32> to vector<8x32xf32>
    %334 = arith.subf %317, %333 : vector<8x32xf32>
    %cst_170 = arith.constant 9.99999974E-6 : f32
    %335 = vector.broadcast %cst_170 : f32 to vector<8x1xf32>
    %336 = arith.addf %332, %335 : vector<8x1xf32>
    %337 = math.rsqrt %336 : vector<8x1xf32>
    %338 = vector.broadcast %337 : vector<8x1xf32> to vector<8x32xf32>
    %339 = arith.mulf %334, %338 : vector<8x32xf32>
    %340 = vector.broadcast %319 : vector<1x32xf32> to vector<8x32xf32>
    %341 = arith.mulf %339, %340 : vector<8x32xf32>
    %342 = vector.broadcast %321 : vector<1x32xf32> to vector<8x32xf32>
    %343 = arith.addf %341, %342 : vector<8x32xf32>
    %344 = arith.truncf %343 : vector<8x32xf32> to vector<8x32xbf16>
    %c1_171 = arith.constant 1 : index
    %c0_172 = arith.constant 0 : index
    %c0_173 = arith.constant 0 : index
    %345 = vector.load %arg11[%c1_171, %c0_172, %c0_173] : memref<2x32x128xbf16, #tpu.memory_space<vmem>>, vector<1x32x128xbf16>
    %346 = vector.shape_cast %345 : vector<1x32x128xbf16> to vector<32x128xbf16>
    %cst_174 = arith.constant dense<0.000000e+00> : vector<8x128xf32>
    %347 = tpu.matmul %344, %346, %cst_174 {dimension_numbers = #tpu.dot_dimension_numbers<[1], [0], [0], [1], [0, 0, 1, 1], [], []>} : vector<8x32xbf16>, vector<32x128xbf16>, vector<8x128xf32> -> vector<8x128xf32>
    %c1_175 = arith.constant 1 : index
    %c0_176 = arith.constant 0 : index
    %c0_177 = arith.constant 0 : index
    %348 = vector.load %arg12[%c1_175, %c0_176, %c0_177] : memref<2x1x128xf32, #tpu.memory_space<vmem>>, vector<1x1x128xf32>
    %349 = vector.shape_cast %348 : vector<1x1x128xf32> to vector<1x128xf32>
    %350 = vector.broadcast %349 : vector<1x128xf32> to vector<8x128xf32>
    %351 = arith.addf %347, %350 : vector<8x128xf32>
    %cst_178 = arith.constant 0.000000e+00 : f32
    %352 = vector.broadcast %cst_178 : f32 to vector<8x128xf32>
    %353 = arith.maximumf %351, %352 : vector<8x128xf32>
    %354 = arith.truncf %353 : vector<8x128xf32> to vector<8x128xbf16>
    %c1_179 = arith.constant 1 : index
    %c0_180 = arith.constant 0 : index
    %c0_181 = arith.constant 0 : index
    %355 = vector.load %arg13[%c1_179, %c0_180, %c0_181] : memref<2x128x32xbf16, #tpu.memory_space<vmem>>, vector<1x128x32xbf16>
    %356 = vector.shape_cast %355 : vector<1x128x32xbf16> to vector<128x32xbf16>
    %cst_182 = arith.constant dense<0.000000e+00> : vector<8x32xf32>
    %357 = tpu.matmul %354, %356, %cst_182 {dimension_numbers = #tpu.dot_dimension_numbers<[1], [0], [0], [1], [0, 0, 1, 1], [], []>} : vector<8x128xbf16>, vector<128x32xbf16>, vector<8x32xf32> -> vector<8x32xf32>
    %358 = arith.addf %317, %357 : vector<8x32xf32>
    %c1_183 = arith.constant 1 : index
    %c0_184 = arith.constant 0 : index
    %c0_185 = arith.constant 0 : index
    %359 = vector.load %arg14[%c1_183, %c0_184, %c0_185] : memref<2x1x32xf32, #tpu.memory_space<vmem>>, vector<1x1x32xf32>
    %360 = vector.shape_cast %359 : vector<1x1x32xf32> to vector<1x32xf32>
    %361 = vector.broadcast %360 : vector<1x32xf32> to vector<8x32xf32>
    %362 = arith.addf %358, %361 : vector<8x32xf32>
    %c0_186 = arith.constant 0 : index
    %c0_187 = arith.constant 0 : index
    %363 = vector.load %arg15[%c0_186, %c0_187] : memref<1x32xf32, #tpu.memory_space<vmem>>, vector<1x32xf32>
    %c0_188 = arith.constant 0 : index
    %c0_189 = arith.constant 0 : index
    %364 = vector.load %arg16[%c0_188, %c0_189] : memref<1x32xf32, #tpu.memory_space<vmem>>, vector<1x32xf32>
    %cst_190 = arith.constant dense<0.000000e+00> : vector<8xf32>
    %365 = vector.multi_reduction <add>, %362, %cst_190 [1] : vector<8x32xf32> to vector<8xf32>
    %366 = vector.shape_cast %365 : vector<8xf32> to vector<8x1xf32>
    %cst_191 = arith.constant 3.200000e+01 : f32
    %367 = vector.broadcast %cst_191 : f32 to vector<8x1xf32>
    %368 = arith.divf %366, %367 : vector<8x1xf32>
    %369 = vector.broadcast %368 : vector<8x1xf32> to vector<8x32xf32>
    %370 = arith.subf %362, %369 : vector<8x32xf32>
    %371 = arith.mulf %370, %370 : vector<8x32xf32>
    %cst_192 = arith.constant dense<0.000000e+00> : vector<8xf32>
    %372 = vector.multi_reduction <add>, %371, %cst_192 [1] : vector<8x32xf32> to vector<8xf32>
    %373 = vector.shape_cast %372 : vector<8xf32> to vector<8x1xf32>
    %cst_193 = arith.constant 3.200000e+01 : f32
    %374 = vector.broadcast %cst_193 : f32 to vector<8x1xf32>
    %375 = arith.divf %373, %374 : vector<8x1xf32>
    %376 = vector.broadcast %368 : vector<8x1xf32> to vector<8x32xf32>
    %377 = arith.subf %362, %376 : vector<8x32xf32>
    %cst_194 = arith.constant 9.99999974E-6 : f32
    %378 = vector.broadcast %cst_194 : f32 to vector<8x1xf32>
    %379 = arith.addf %375, %378 : vector<8x1xf32>
    %380 = math.rsqrt %379 : vector<8x1xf32>
    %381 = vector.broadcast %380 : vector<8x1xf32> to vector<8x32xf32>
    %382 = arith.mulf %377, %381 : vector<8x32xf32>
    %383 = vector.broadcast %363 : vector<1x32xf32> to vector<8x32xf32>
    %384 = arith.mulf %382, %383 : vector<8x32xf32>
    %385 = vector.broadcast %364 : vector<1x32xf32> to vector<8x32xf32>
    %386 = arith.addf %384, %385 : vector<8x32xf32>
    %387 = arith.truncf %386 : vector<8x32xf32> to vector<8x32xbf16>
    %c0_195 = arith.constant 0 : index
    %c0_196 = arith.constant 0 : index
    %388 = vector.load %arg17[%c0_195, %c0_196] : memref<32x128xbf16, #tpu.memory_space<vmem>>, vector<32x128xbf16>
    %cst_197 = arith.constant dense<0.000000e+00> : vector<8x128xf32>
    %389 = tpu.matmul %387, %388, %cst_197 {dimension_numbers = #tpu.dot_dimension_numbers<[1], [0], [0], [1], [0, 0, 1, 1], [], []>} : vector<8x32xbf16>, vector<32x128xbf16>, vector<8x128xf32> -> vector<8x128xf32>
    %c0_198 = arith.constant 0 : index
    %c0_199 = arith.constant 0 : index
    %390 = vector.load %arg18[%c0_198, %c0_199] : memref<1x128xf32, #tpu.memory_space<vmem>>, vector<1x128xf32>
    %391 = vector.broadcast %390 : vector<1x128xf32> to vector<8x128xf32>
    %392 = arith.addf %389, %391 : vector<8x128xf32>
    %c0_200 = arith.constant 0 : index
    %c0_201 = arith.constant 0 : index
    %393 = vector.load %arg19[%c0_200, %c0_201] : memref<8x128xf32, #tpu.memory_space<vmem>>, vector<8x128xf32>
    tpu.vector_store %arg19[%c0_200, %c0_201], %392 {strides = array<i32>} : memref<8x128xf32, #tpu.memory_space<vmem>>, vector<8x128xf32>,
    return
  }
  func.func @transform_0(%arg0: i32) -> (i32, i32) {
    %c0_i32 = arith.constant 0 : i32
    %c0_i32_0 = arith.constant 0 : i32
    return %arg0, %c0_i32 : i32, i32
  }
  func.func @transform_1(%arg0: i32) -> (i32, i32) {
    %c0_i32 = arith.constant 0 : i32
    %c0_i32_0 = arith.constant 0 : i32
    %c0_i32_1 = arith.constant 0 : i32
    return %c0_i32, %c0_i32_0 : i32, i32
  }
  func.func @transform_2(%arg0: i32) -> (i32, i32) {
    %c0_i32 = arith.constant 0 : i32
    %c0_i32_0 = arith.constant 0 : i32
    %c0_i32_1 = arith.constant 0 : i32
    return %c0_i32, %c0_i32_0 : i32, i32
  }
  func.func @transform_3(%arg0: i32) -> (i32, i32, i32) {
    %c0_i32 = arith.constant 0 : i32
    %c0_i32_0 = arith.constant 0 : i32
    %c0_i32_1 = arith.constant 0 : i32
    %c0_i32_2 = arith.constant 0 : i32
    return %c0_i32, %c0_i32_0, %c0_i32_1 : i32, i32, i32
  }
  func.func @transform_4(%arg0: i32) -> (i32, i32, i32) {
    %c0_i32 = arith.constant 0 : i32
    %c0_i32_0 = arith.constant 0 : i32
    %c0_i32_1 = arith.constant 0 : i32
    %c0_i32_2 = arith.constant 0 : i32
    return %c0_i32, %c0_i32_0, %c0_i32_1 : i32, i32, i32
  }
  func.func @transform_5(%arg0: i32) -> (i32, i32, i32) {
    %c0_i32 = arith.constant 0 : i32
    %c0_i32_0 = arith.constant 0 : i32
    %c0_i32_1 = arith.constant 0 : i32
    %c0_i32_2 = arith.constant 0 : i32
    return %c0_i32, %c0_i32_0, %c0_i32_1 : i32, i32, i32
  }
  func.func @transform_6(%arg0: i32) -> (i32, i32, i32) {
    %c0_i32 = arith.constant 0 : i32
    %c0_i32_0 = arith.constant 0 : i32
    %c0_i32_1 = arith.constant 0 : i32
    %c0_i32_2 = arith.constant 0 : i32
    return %c0_i32, %c0_i32_0, %c0_i32_1 : i32, i32, i32
  }
  func.func @transform_7(%arg0: i32) -> (i32, i32, i32) {
    %c0_i32 = arith.constant 0 : i32
    %c0_i32_0 = arith.constant 0 : i32
    %c0_i32_1 = arith.constant 0 : i32
    %c0_i32_2 = arith.constant 0 : i32
    return %c0_i32, %c0_i32_0, %c0_i32_1 : i32, i32, i32
  }
  func.func @transform_8(%arg0: i32) -> (i32, i32, i32) {
    %c0_i32 = arith.constant 0 : i32
    %c0_i32_0 = arith.constant 0 : i32
    %c0_i32_1 = arith.constant 0 : i32
    %c0_i32_2 = arith.constant 0 : i32
    return %c0_i32, %c0_i32_0, %c0_i32_1 : i32, i32, i32
  }
  func.func @transform_9(%arg0: i32) -> (i32, i32, i32) {
    %c0_i32 = arith.constant 0 : i32
    %c0_i32_0 = arith.constant 0 : i32
    %c0_i32_1 = arith.constant 0 : i32
    %c0_i32_2 = arith.constant 0 : i32
    return %c0_i32, %c0_i32_0, %c0_i32_1 : i32, i32, i32
  }
  func.func @transform_10(%arg0: i32) -> (i32, i32, i32) {
    %c0_i32 = arith.constant 0 : i32
    %c0_i32_0 = arith.constant 0 : i32
    %c0_i32_1 = arith.constant 0 : i32
    %c0_i32_2 = arith.constant 0 : i32
    return %c0_i32, %c0_i32_0, %c0_i32_1 : i32, i32, i32
  }
  func.func @transform_11(%arg0: i32) -> (i32, i32, i32) {
    %c0_i32 = arith.constant 0 : i32
    %c0_i32_0 = arith.constant 0 : i32
    %c0_i32_1 = arith.constant 0 : i32
    %c0_i32_2 = arith.constant 0 : i32
    return %c0_i32, %c0_i32_0, %c0_i32_1 : i32, i32, i32
  }
  func.func @transform_12(%arg0: i32) -> (i32, i32, i32) {
    %c0_i32 = arith.constant 0 : i32
    %c0_i32_0 = arith.constant 0 : i32
    %c0_i32_1 = arith.constant 0 : i32
    %c0_i32_2 = arith.constant 0 : i32
    return %c0_i32, %c0_i32_0, %c0_i32_1 : i32, i32, i32
  }
  func.func @transform_13(%arg0: i32) -> (i32, i32, i32) {
    %c0_i32 = arith.constant 0 : i32
    %c0_i32_0 = arith.constant 0 : i32
    %c0_i32_1 = arith.constant 0 : i32
    %c0_i32_2 = arith.constant 0 : i32
    return %c0_i32, %c0_i32_0, %c0_i32_1 : i32, i32, i32
  }
  func.func @transform_14(%arg0: i32) -> (i32, i32) {
    %c0_i32 = arith.constant 0 : i32
    %c0_i32_0 = arith.constant 0 : i32
    %c0_i32_1 = arith.constant 0 : i32
    return %c0_i32, %c0_i32_0 : i32, i32
  }
  func.func @transform_15(%arg0: i32) -> (i32, i32) {
    %c0_i32 = arith.constant 0 : i32
    %c0_i32_0 = arith.constant 0 : i32
    %c0_i32_1 = arith.constant 0 : i32
    return %c0_i32, %c0_i32_0 : i32, i32
  }
  func.func @transform_16(%arg0: i32) -> (i32, i32) {
    %c0_i32 = arith.constant 0 : i32
    %c0_i32_0 = arith.constant 0 : i32
    %c0_i32_1 = arith.constant 0 : i32
    return %c0_i32, %c0_i32_0 : i32, i32
  }
  func.func @transform_17(%arg0: i32) -> (i32, i32) {
    %c0_i32 = arith.constant 0 : i32
    %c0_i32_0 = arith.constant 0 : i32
    %c0_i32_1 = arith.constant 0 : i32
    return %c0_i32, %c0_i32_0 : i32, i32
  }
  func.func @transform_18(%arg0: i32) -> (i32, i32) {
    %c0_i32 = arith.constant 0 : i32
    %c0_i32_0 = arith.constant 0 : i32
    return %arg0, %c0_i32 : i32, i32
  }
}

</mosaic_0001>

<bundles_post_ra>
// kernel: transformer_language_model.1
= control target key start
LH: loop header
LB: loop body
LE: loop exit
PB: predicated region body
PF: predicated region fallthrough
CT: control target
= control target key end

     0   :  { %s3709_s0 = inlined_call_operand.vmem [shape: s32[16,1], index: 0, kind: input, shape index: {}]   ;;  %s3710_s1 = inlined_call_operand.vmem [shape: bf16[64,32], index: 1, kind: input, shape index: {}]   ;;  %s3711_s2 = inlined_call_operand.vmem [shape: f32[8,32], index: 2, kind: input, shape index: {}]   ;;  %s3712_s3 = inlined_call_operand.vmem [shape: f32[2,1,32], index: 3, kind: input, shape index: {}]   ;;  %s3713_s4 = inlined_call_operand.vmem [shape: f32[2,1,32], index: 4, kind: input, shape index: {}]   ;;  %s3714_s5 = inlined_call_operand.vmem [shape: bf16[8,32,32], index: 5, kind: input, shape index: {}]   ;;  %s3715_s6 = inlined_call_operand.hbm [shape: bf16[8,32,32], index: 6, kind: input, shape index: {}]   ;;  %s3716_s7 = inlined_call_operand.hbm [shape: f32[2,1,32], index: 7, kind: input, shape index: {}]   ;;  %s3717_s8 = inlined_call_operand.hbm [shape: f32[2,1,32], index: 8, kind: input, shape index: {}]   ;;  %s3718_s9 = inlined_call_operand.hbm [shape: f32[2,1,32], index: 9, kind: input, shape index: {}]   ;;  %s3719_s10 = inlined_call_operand.vmem [shape: bf16[2,32,128], index: 10, kind: input, shape index: {}]   ;;  %s3720_s11 = inlined_call_operand.hbm [shape: f32[2,1,128], index: 11, kind: input, shape index: {}]   ;;  %s3721_s12 = inlined_call_operand.vmem [shape: bf16[2,128,32], index: 12, kind: input, shape index: {}]   ;;  %s3722_s13 = inlined_call_operand.hbm [shape: f32[2,1,32], index: 13, kind: input, shape index: {}]   ;;  %s3723_s14 = inlined_call_operand.vmem [shape: f32[1,32], index: 14, kind: input, shape index: {}]   ;;  %s3724_s15 = inlined_call_operand.hbm [shape: f32[1,32], index: 15, kind: input, shape index: {}]   ;;  %s3725_s16 = inlined_call_operand.vmem [shape: bf16[32,128], index: 16, kind: input, shape index: {}]   ;;  %s3726_s17 = inlined_call_operand.hbm [shape: f32[1,128], index: 17, kind: input, shape index: {}]   ;;  %s3727_s18 = inlined_call_operand.vmem [shape: f32[16,128], index: 18, kind: output, shape index: {}]  }
   0x1   :  { %3730 = sst [smem:[#allocation21_spill]] %s3709_s0 }
   0x2   :  { %3731 = sst [smem:[#allocation22_spill]] %s3710_s1 }
   0x3   :  { %3732 = sst [smem:[#allocation23_spill]] %s3711_s2 }
   0x4   :  { %3733 = sst [smem:[#allocation24_spill]] %s3715_s6 }
   0x5   :  { %3734 = sst [smem:[#allocation25_spill]] %s3716_s7 }
   0x6   :  { %3735 = sst [smem:[#allocation26_spill]] %s3718_s9 }
   0x7   :  { %3736 = sst [smem:[#allocation27_spill]] %s3722_s13 }
   0x8   :  { %23 = vsyncpa [#allocation3], 0 }
   0x9   :  { %24 = vsyncpa [#allocation5], 0 }
   0xa   :  { %25 = vsyncpa [#allocation8], 0 }
   0xb   :  { %26 = vsyncpa [#allocation11], 0 }
   0xc   :  { %27 = vsyncpa [#allocation14], 0  ;;  %s3299_s27 = smov 0  }
   0xd LB: > { %3737 = sst [smem:[#allocation20_spill]] %s3187_s27  ;;  %s3308_s0 = sadd.s32 4294967295, %s3187_s27   ;;  %s3187_s27 = sphi %s3299_s27, %s33_s27  }
   0xe   : > { %s3738_s7 = sld [smem:[#allocation25_spill]]  ;;  %p2364_p0 = scmp.ge.s32.totalorder %s3187_s27, 1 }
   0xf   : > { %p447_p1 = scmp.lt.s32.totalorder %s3187_s27, 3  ;;  %p2820_p2 = scmp.eq.s32.totalorder %s3308_s0, 0 }
  0x10   : > { %s3189_s1 = smov [#allocation4]   ;;  %s3740_s9 = sld [smem:[#allocation26_spill]] }
  0x11   : > { %p3313_p3 = pnand %p2364_p0, %p447_p1  ;;  %s489_s20 = sshll.u32 %s3189_s1, 4  ;;  %s490_s20 = int_to_ptr.vmem [resolvable:$true] %s489_s20 }
  0x12   : > { %s3190_s24 = smov [#allocation7]   ;;  %s3742_s13 = sld [smem:[#allocation27_spill]] }
  0x13   : > { %p2795_p4 = pneg %p3313_p3  ;;  %s517_s25 = sshll.u32 %s3190_s24, 4  ;;  %s518_s25 = int_to_ptr.vmem [resolvable:$true] %s517_s25 }
  0x14   : > { %s487_s30 = sshll.u32 %s3738_s7, 4  ;;  %s3191_s1 = smov 16   ;;  %s488_s30 = int_to_ptr.hbm [resolvable:$true] %s487_s30 }
  0x15   : > { %p3324_p5 = pnand %p2820_p2, %p2795_p4  ;;  %s3192_s7 = smov 1  }
  0x16   : > { %s515_s2 = sshll.u32 %s3740_s9, 4  ;;  %s3193_s21 = smov [#allocation10]   ;;  %s516_s2 = int_to_ptr.hbm [resolvable:$true] %s515_s2 }
  0x17   : > { %2801 = dma.hbm_to_vmem [thread:$0]  (!%p3324_p5), %s488_s30, 32, %s490_s20, [#allocation5], %s3191_s1, %s3191_s1, %s3192_s7  }
  0x18   : > { %s549_s29 = sshll.u32 %s3742_s13, 4  ;;  %s551_s22 = sshll.u32 %s3193_s21, 4  ;;  %s550_s29 = int_to_ptr.hbm [resolvable:$true] %s549_s29  ;;  %s552_s22 = int_to_ptr.vmem [resolvable:$true] %s551_s22 }
  0x19   : > { %2807 = dma.hbm_to_vmem [thread:$0]  (!%p3324_p5), %s516_s2, 32, %s518_s25, [#allocation8], %s3191_s1, %s3191_s1, %s3192_s7  }
  0x1a   : > { %s3743_s6 = sld [smem:[#allocation24_spill]]  ;;  %s3194_s30 = smov [#allocation2]  }
  0x1b   : > { %2813 = dma.hbm_to_vmem [thread:$0]  (!%p3324_p5), %s550_s29, 32, %s552_s22, [#allocation11], %s3191_s1, %s3191_s1, %s3192_s7  }
  0x1c   : > { %s475_s20 = sshll.u32 %s3194_s30, 4  ;;  %s501_s25 = sshll.u32 %s3717_s8, 4  ;;  %s476_s20 = int_to_ptr.vmem [resolvable:$true] %s475_s20  ;;  %s502_s25 = int_to_ptr.hbm [resolvable:$true] %s501_s25 }
  0x1d   : > { %s3195_s21 = smov 64   ;;  %s3196_s13 = smov 4  }
  0x1e   : > { %s3197_s24 = smov [#allocation6]   ;;  %s532_s29 = sshll.u32 %s3720_s11, 4  ;;  %s533_s29 = int_to_ptr.hbm [resolvable:$true] %s532_s29 }
  0x1f   : > { %s503_s26 = sshll.u32 %s3197_s24, 4  ;;  %s504_s26 = int_to_ptr.vmem [resolvable:$true] %s503_s26 }
  0x20   : > { %s473_s28 = sshll.u32 %s3743_s6, 4  ;;  %s3199_s6 = smov [#allocation12]   ;;  %s474_s28 = int_to_ptr.hbm [resolvable:$true] %s473_s28 }
  0x21   : > { %2798 = dma.hbm_to_vmem [thread:$0]  (!%p3324_p5), %s474_s28, 2048, %s476_s20, [#allocation3], %s3195_s21, %s3195_s21, %s3196_s13  }
  0x22   : > { %2804 = dma.hbm_to_vmem [thread:$0]  (!%p3324_p5), %s502_s25, 32, %s504_s26, [#allocation5], %s3191_s1, %s3191_s1, %s3192_s7  }
  0x23   : > { %s567_s13 = sshll.u32 %s3724_s15, 4  ;;  %s3198_s28 = smov [#allocation9]   ;;  %s568_s13 = int_to_ptr.hbm [resolvable:$true] %s567_s13 }
  0x24   : > { %s534_s30 = sshll.u32 %s3198_s28, 4  ;;  %s569_s27 = sshll.u32 %s3199_s6, 4  ;;  %s535_s30 = int_to_ptr.vmem [resolvable:$true] %s534_s30  ;;  %s570_s27 = int_to_ptr.vmem [resolvable:$true] %s569_s27 }
  0x25   : > { %2810 = dma.hbm_to_vmem [thread:$0]  (!%p3324_p5), %s533_s29, 32, %s535_s30, [#allocation8], %s3191_s1, %s3191_s1, %s3192_s7  }
  0x26   : > { %s582_s25 = sshll.u32 %s3726_s17, 4  ;;  %s3200_s21 = smov [#allocation13]   ;;  %s583_s25 = int_to_ptr.hbm [resolvable:$true] %s582_s25 }
  0x27   : > { %2816 = dma.hbm_to_vmem [thread:$0]  (!%p3324_p5), %s568_s13, 16, %s570_s27, [#allocation11]  }
  0x28   : > { %s584_s24 = sshll.u32 %s3200_s21, 4  ;;  %604 = sbr.rel (%p3313_p3) target bundleno = 4023 (0xfb7), region = 92  ;;  %s585_s24 = int_to_ptr.vmem [resolvable:$true] %s584_s24 }
  0x29   : > { %2819 = dma.hbm_to_vmem [thread:$0]  (!%p3324_p5), %s583_s25, 16, %s585_s24, [#allocation14]  }
  0x2d   : > { %3166 = dma.done.wait (%p2820_p2), [#allocation3], 2048  }
  0x2e   : > { %3168 = vsyncadd (%p2820_p2), [#allocation3], 4294965248 }
  0x2f   : > { %3170 = dma.done.wait (%p2820_p2), [#allocation5], 64  }
  0x30   : > { %3172 = vsyncadd (%p2820_p2), [#allocation5], 4294967232 }
  0x31   : > { %3174 = dma.done.wait (%p2820_p2), [#allocation8], 64  }
  0x32   : > { %3176 = vsyncadd (%p2820_p2), [#allocation8], 4294967232 }
  0x33   : > { %3178 = dma.done.wait (%p2820_p2), [#allocation11], 48  }
  0x34   : > { %3180 = vsyncadd (%p2820_p2), [#allocation11], 4294967248 }
  0x35   : > { %3182 = dma.done.wait (%p2820_p2), [#allocation14], 16  }
  0x36   : > { %3184 = vsyncadd (%p2820_p2), [#allocation14], 4294967280  ;;  %p692_p6 = scmp.lt.s32.totalorder %s3308_s0, 1  ;;  %v3201_v0 = vmov 0   ;;  %s3744_s1 = sld [smem:[#allocation21_spill]]  ;;  %v702_v6 = vlaneseq  ;;  %v3202_v9 = vmov 0.0  }
  0x37   : > { %2859 = vset.pattern.permute.xlu0 %v3201_v0  ;;  %s3745_s22 = sld [smem:[#allocation22_spill]]  ;;  %vm743_vm1 = vcmask 523264   ;;  %vm765_vm2 = vcmask 261120   ;;  %v3203_v17 = vmov 32.0   ;;  %v2712_v29 = vld [vmem:[#allocation2 + $0x8] sm:$0xff]  ;;  %v2711_v31 = vld [vmem:[#allocation2] sm:$0xff] }
  0x38   : > { %s3751_s0 = smov (!%p692_p6, %s3308_s0), 1  ;;  %v3422_v7 = vand.u32 127, %v702_v6  ;;  %s3746_s21 = sld [smem:[#allocation23_spill]]  ;;  %2877 = vrcp.f32 %v3203_v17  ;;  %901 = vmatpush.bf16.msra.mxu3 %v2712_v29  ;;  %v2710_v30 = vld [vmem:[%s3714_s5 + $0x8] sm:$0xff]  ;;  %v2716_v32 = vld [vmem:[#allocation2 + $0x18] sm:$0xff]  ;;  %v2709_v33 = vld [vmem:[%s3714_s5] sm:$0xff] }
  0x39   : > { %s2383_s7 = sshll.u32 %s3751_s0, 3  ;;  %829 = vmatpush.bf16.msra.mxu1 %v2710_v30  ;;  %v2715_v34 = vld [vmem:[#allocation2 + $0x10] sm:$0xff]  ;;  %v2714_v37 = vld [vmem:[%s3714_s5 + $0x18] sm:$0xff]  ;;  %v2860_v46 = vld [vmem:[%s3712_s3] ss:$0 sm:$0xff]  ;;  %vm1017_vm7 = vcmask 1043456  }
  0x3a   : > { %v2713_v39 = vld [vmem:[%s3714_s5 + $0x10] sm:$0xff]  ;;  %v2861_v48 = vld [vmem:[%s3713_s4] ss:$0 sm:$0xff]  ;;  %v2718_v54 = vld [vmem:[%s3714_s5 + $0x28] sm:$0xff]  ;;  %vm854_vm9 = vcmask 64512   ;;  %s699_s28 = scalar_lea.vmem %s3727_s18, %s2383_s7 }
  0x3b   : > { %v2717_v55 = vld [vmem:[%s3714_s5 + $0x20] sm:$0xff]  ;;  %v2722_v0 = vld [vmem:[%s3714_s5 + $0x38] sm:$0xff] }
  0x3c   : > { %s695_s26 = scalar_lea.vmem %s3744_s1, %s2383_s7  ;;  %902 = vmatpush.bf16.msra.mxu3 %v2711_v31 }
  0x3d   : > { %v701_v1 = vld [vmem:[%s695_s26] sm:$0xff]  ;;  %v2708_v2 = vld [vmem:[%s3745_s22 + $0x18] sm:$0xff]  ;;  %v2707_v3 = vld [vmem:[%s3745_s22 + $0x10] sm:$0xff]  ;;  %830 = vmatpush.bf16.msra.mxu1 %v2709_v33 }
  0x3e   : > { %705 = vperm.xlu0 %2859, %v701_v1   ;;  %751 = vmatpush.bf16.msra.mxu0 %v2708_v2  ;;  %v2706_v4 = vld [vmem:[%s3745_s22 + $0x8] sm:$0xff]  ;;  %v2705_v5 = vld [vmem:[%s3745_s22] sm:$0xff]  ;;  %v2878_v18 = vpop.eup %2877  ;;  %v2721_v2 = vld [vmem:[%s3714_s5 + $0x30] sm:$0xff] }
  0x3f   : > { %v718_v12 = vld [vmem:[%s3746_s21] sm:$0xff]  ;;  %v770_v19 = vmul.f32 32.0, %v2878_v18  ;;  %vm774_vm3 = vweird.f32 %v2878_v18 }
  0x40   : > { %1005 = vmatpush.bf16.msrb.mxu3 %v2716_v32 }
  0x41   : > { %v771_v20 = vsub.f32 1.0, %v770_v19  ;;  %933 = vmatpush.bf16.msrb.mxu1 %v2714_v37 }
  0x42   : > { %752 = vmatpush.bf16.msra.mxu0 %v2707_v3 }
  0x43   : > { %v772_v21 = vmul.f32 %v2878_v18, %v771_v20 }
  0x44   : > { %1006 = vmatpush.bf16.msrb.mxu3 %v2715_v34 }
  0x45   : > { %v773_v22 = vadd.f32 %v2878_v18, %v772_v21  ;;  %934 = vmatpush.bf16.msrb.mxu1 %v2713_v39  ;;  %v2720_v39 = vld [vmem:[#allocation2 + $0x28] sm:$0xff] }
  0x46   : > { %753 = vmatpush.bf16.msra.mxu0 %v2706_v4 }
  0x47   : > { %v3432_v23 = vsel %vm774_vm3, %v2878_v18, %v773_v22 }
  0x4a   : > { %754 = vmatpush.bf16.msra.mxu0 %v2705_v5 }
  0xb0   : > { %v706_v8 = vpop.permute.xlu0 %705 }
  0xb1   : > { %vm707_vm0 = vcmp.eq.s32.totalorder %v3422_v7, %v706_v8 }
  0xb2   : > { %v708_v10 = vsel %vm707_vm0, 1.0, %v3202_v9 }
  0xb3   : > { %v709_v11 = vpack.c.bf16 %v708_v10, %v708_v10 }
  0xb5   : > { %2401 = vmatmul.msk.bf16.vlgmr.msra.gmra.mxu0 %vm743_vm1, %v709_v11 }
 0x132   : > { %v756_v13 = vpop.f32.mrf.mxu0 }
 0x133   : > { %v3428_v14 = vadd.f32 %v756_v13, %v718_v12  ;;  %v761_v12 = vshrl.u32 %v702_v6, 7 }
 0x135   : > { %v766_v15 = vsel %vm765_vm2, %v3428_v14, 0.0  ;;  %vm3490_vm8 = vcmp.ge.s32.totalorder %v761_v12, %v3422_v7 }
 0x136   : > { %767 = vadd.xlane.f32.xlu0 %v766_v15 }
 0x13a   : > { %v758_v16 = vpop.f32.mrf.mxu0 }
 0x1a9   : > { %v768_v24 = vpop.xlane.xlu0 %767 }
 0x1aa   : > { %v776_v25 = vmul.f32 %v3432_v23, %v768_v24 }
 0x1ac   : > { %v777_v26 = vsub.f32 %v3428_v14, %v776_v25 }
 0x1ae   : > { %v778_v27 = vmul.f32 %v777_v26, %v777_v26 }
 0x1b0   : > { %v779_v28 = vsel %vm765_vm2, %v778_v27, 0.0 }
 0x1b1   : > { %780 = vadd.xlane.f32.xlu1 %v779_v28 }
 0x224   : > { %v781_v35 = vpop.xlane.xlu1 %780 }
 0x225   : > { %v782_v36 = vmul.f32 %v781_v35, %v3432_v23 }
 0x227   : > { %v783_v38 = vadd.f32 1e-05, %v782_v36 }
 0x229   : > { %2879 = vrsqrt.f32 %v783_v38  ;;  %vm790_vm5 = vweird.f32 %v783_v38 }
 0x22f   : > { %v2880_v40 = vpop.eup %2879 }
 0x230   : > { %v785_v41 = vmul.f32 %v2880_v40, %v783_v38  ;;  %vm791_vm4 = vweird.f32 %v2880_v40 }
 0x231   : > { %vm792_vm6 = vmor %vm790_vm5, %vm791_vm4 }
 0x232   : > { %v786_v42 = vmul.f32 %v2880_v40, %v785_v41 }
 0x234   : > { %v787_v43 = vmul.f32 0.5, %v786_v42 }
 0x236   : > { %v788_v44 = vsub.f32 1.5, %v787_v43 }
 0x238   : > { %v789_v45 = vmul.f32 %v2880_v40, %v788_v44 }
 0x23a   : > { %v793_v47 = vsel %vm792_vm6, %v2880_v40, %v789_v45  ;;  %v2719_v40 = vld [vmem:[#allocation2 + $0x20] sm:$0xff] }
 0x23b   : > { %v794_v49 = vmul.f32 %v793_v47, %v777_v26 }
 0x23d   : > { %v798_v50 = vmul.f32 %v2860_v46, %v794_v49 }
 0x23f   : > { %v802_v51 = vadd.f32 %v2861_v48, %v798_v50 }
 0x241   : > { %v3456_v52 = vpack.c.bf16 %v802_v51, %v802_v51 }
 0x243   : > { %2410 = vmatmul.msk.bf16.vlgmr.msra.gmra.mxu1 %vm765_vm2, %v3456_v52  ;;  %2420 = vmatmul.msk.bf16.vlgmr.msra.gmra.mxu3 %vm765_vm2, %v3456_v52  ;;  %v821_v53 = vsel %vm765_vm2, %v3456_v52, 0 }
 0x244   : > { %847 = vmatpush.bf16.xpose.msrb.mxu0 %v821_v53  ;;  %951 = vmatpush.bf16.xpose.msra.mxu2 %v821_v53 }
 0x245   : > { %1094 = vmatpush.bf16.xpose.msra.mxu3 %v821_v53 }
 0x24c   : > { %1076 = vmatpush.bf16.msrb.mxu2 %v2718_v54 }
 0x250   : > { %1077 = vmatpush.bf16.msrb.mxu2 %v2717_v55 }
 0x253   : > { %2433 = vmatmul.msk.bf16.vlgmr.msrb.gmra.mxu1 %vm765_vm2, %v3456_v52  ;;  %2443 = vmatmul.msk.bf16.vlgmr.msrb.gmra.mxu3 %vm765_vm2, %v3456_v52 }
 0x254   : > { %1218 = vmatpush.bf16.xpose.msrb.mxu3 %v821_v53 }
 0x2c0   : > { %v832_v56 = vpop.f32.mrf.mxu1 }
 0x2c1   : > { %v836_v57 = vpack.c.bf16 %v832_v56, %v832_v56 }
 0x2c3   : > { %2411 = vmatmul.msk.bf16.vlgmr.msrb.gmra.mxu0 %vm765_vm2, %v836_v57 }
 0x2c6   : > { %v904_v58 = vpop.f32.mrf.mxu3 }
 0x2c7   : > { %v909_v59 = vpack.c.bf16 %v904_v58, %v904_v58  ;;  %v2724_v58 = vld [vmem:[#allocation2 + $0x38] sm:$0xff] }
 0x2c8   : > { %v834_v60 = vpop.f32.mrf.mxu1 }
 0x2c9   : > { %v1038_v61 = vsel %vm1017_vm7, %v909_v59, 0 }
 0x2ca   : > { %1047 = vmatpush.bf16.msra.mxu1 %v1038_v61 }
 0x2ce   : > { %v906_v62 = vpop.f32.mrf.mxu3 }
 0x2d0   : > { %v936_v63 = vpop.f32.mrf.mxu1 }
 0x2d1   : > { %v940_v1 = vpack.c.bf16 %v936_v63, %v936_v63  ;;  %v2723_v63 = vld [vmem:[#allocation2 + $0x30] sm:$0xff] }
 0x2d3   : > { %2434 = vmatmul.msk.bf16.vlgmr.msra.gmra.mxu2 %vm765_vm2, %v940_v1 }
 0x2d4   : > { %1200 = vmatpush.bf16.msra.mxu2 %v2722_v0 }
 0x2d6   : > { %v1008_v3 = vpop.f32.mrf.mxu3 }
 0x2d7   : > { %v1013_v4 = vpack.c.bf16 %v1008_v3, %v1008_v3 }
 0x2d8   : > { %v938_v5 = vpop.f32.mrf.mxu1  ;;  %1201 = vmatpush.bf16.msra.mxu2 %v2721_v2 }
 0x2d9   : > { %v1019_v8 = vsel %vm1017_vm7, %v1013_v4, 0 }
 0x2da   : > { %1028 = vmatpush.bf16.msra.mxu0 %v1019_v8 }
 0x2de   : > { %v1010_v9 = vpop.f32.mrf.mxu3  ;;  %1148 = vmatpush.bf16.msrb.mxu0 %v2720_v39 }
 0x2e2   : > { %1149 = vmatpush.bf16.msrb.mxu0 %v2719_v40 }
 0x2e3   : > { %2458 = vmatmul.msk.bf16.vlgmr.msrb.gmra.mxu2 %vm765_vm2, %v3456_v52 }
 0x2f3   : > { %2482 = vmatmul.msk.bf16.vlgmr.msra.gmra.mxu2 %vm765_vm2, %v3456_v52 }
 0x340   : > { %v849_v10 = vpop.f32.mrf.mxu0 }
 0x341   : > { %v853_v29 = vsel %vm3490_vm8, %v849_v10, -inf }
 0x342   : > { %v855_v30 = vsel %vm854_vm9, %v853_v29, -inf }
 0x348   : > { %v851_v11 = vpop.f32.mrf.mxu0 }
 0x356   : > { %v953_v15 = vpop.f32.mrf.mxu2 }
 0x357   : > { %v957_v16 = vsel %vm3490_vm8, %v953_v15, -inf }
 0x358   : > { %v958_v17 = vsel %vm854_vm9, %v957_v16, -inf }
 0x359   : > { %959 = vmax.xlane.f32.xlu1 %v958_v17 }
 0x35e   : > { %v955_v18 = vpop.f32.mrf.mxu2 }
 0x366   : > { %v1079_v19 = vpop.f32.mrf.mxu2 }
 0x367   : > { %v1083_v20 = vpack.c.bf16 %v1079_v19, %v1079_v19 }
 0x369   : > { %2459 = vmatmul.msk.bf16.vlgmr.msra.gmra.mxu3 %vm765_vm2, %v1083_v20 }
 0x36e   : > { %v1081_v21 = vpop.f32.mrf.mxu2 }
 0x376   : > { %v1203_v6 = vpop.f32.mrf.mxu2 }
 0x377   : > { %v1207_v22 = vpack.c.bf16 %v1203_v6, %v1203_v6 }
 0x379   : > { %2483 = vmatmul.msk.bf16.vlgmr.msrb.gmra.mxu3 %vm765_vm2, %v1207_v22 }
 0x37e   : > { %v1205_v7 = vpop.f32.mrf.mxu2 }
 0x3cc   : > { %v960_v24 = vpop.xlane.xlu1 %959 }
 0x3cd   : > { %v961_v25 = vsub.f32 %v957_v16, %v960_v24 }
 0x3cf   : > { %v962_v26 = vmul.f32 1.442695, %v961_v25 }
 0x3d1   : > { %2881 = vpow2.f32 %v962_v26 }
 0x3d7   : > { %v2882_v27 = vpop.eup %2881 }
 0x3d8   : > { %v964_v28 = vsel %vm854_vm9, %v2882_v27, 0.0 }
 0x3d9   : > { %965 = vadd.xlane.f32.xlu2 %v964_v28 }
 0x3e1   : > { %856 = vmax.xlane.f32.xlu2 %v855_v30 }
 0x3ec   : > { %v1096_v31 = vpop.f32.mrf.mxu3 }
 0x3ed   : > { %v1100_v32 = vsel %vm3490_vm8, %v1096_v31, -inf }
 0x3ee   : > { %v1101_v33 = vsel %vm854_vm9, %v1100_v32, -inf }
 0x3ef   : > { %1102 = vmax.xlane.f32.xlu1 %v1101_v33 }
 0x3f4   : > { %v1098_v34 = vpop.f32.mrf.mxu3 }
 0x3fc   : > { %v1220_v35 = vpop.f32.mrf.mxu3 }
 0x3fd   : > { %v1224_v36 = vsel %vm3490_vm8, %v1220_v35, -inf }
 0x3fe   : > { %v1225_v37 = vsel %vm854_vm9, %v1224_v36, -inf }
 0x3ff   : > { %1226 = vmax.xlane.f32.xlu2 %v1225_v37 }
 0x404   : > { %v1222_v38 = vpop.f32.mrf.mxu3 }
 0x44c   : > { %v966_v41 = vpop.xlane.xlu2 %965 }
 0x44d   : > { %2883 = vrcp.f32 %v966_v41  ;;  %v978_v47 = vand.u32 2147483648, %v966_v41  ;;  %v976_v50 = vand.u32 2147483647, %v966_v41  ;;  %vm972_vm11 = vweird.f32 %v966_v41 }
 0x44f   : > { %v979_v53 = vor.u32 1.1754944e-38, %v978_v47  ;;  %vm977_vm13 = vcmp.eq.f32.partialorder %v976_v50, 8.507059e+37 }
 0x453   : > { %v2884_v42 = vpop.eup %2883 }
 0x454   : > { %v968_v43 = vmul.f32 %v2884_v42, %v966_v41  ;;  %v857_v44 = vpop.xlane.xlu2 %856  ;;  %vm973_vm10 = vweird.f32 %v2884_v42 }
 0x455   : > { %v858_v45 = vsub.f32 %v853_v29, %v857_v44  ;;  %vm974_vm12 = vmor %vm972_vm11, %vm973_vm10 }
 0x456   : > { %v969_v46 = vsub.f32 1.0, %v968_v43 }
 0x457   : > { %v859_v48 = vmul.f32 1.442695, %v858_v45 }
 0x458   : > { %v970_v49 = vmul.f32 %v2884_v42, %v969_v46 }
 0x459   : > { %2885 = vpow2.f32 %v859_v48 }
 0x45a   : > { %v971_v51 = vadd.f32 %v2884_v42, %v970_v49 }
 0x45c   : > { %v975_v54 = vsel %vm974_vm12, %v2884_v42, %v971_v51 }
 0x45d   : > { %v980_v55 = vsel %vm977_vm13, %v979_v53, %v975_v54 }
 0x45e   : > { %v981_v56 = vmul.f32 %v2882_v27, %v980_v55 }
 0x45f   : > { %v2886_v57 = vpop.eup %2885 }
 0x460   : > { %v861_v59 = vsel %vm854_vm9, %v2886_v57, 0.0  ;;  %v1012_v60 = vpack.c.bf16 %v981_v56, %v981_v56 }
 0x461   : > { %862 = vadd.xlane.f32.xlu1 %v861_v59 }
 0x462   : > { %v1103_v61 = vpop.xlane.xlu1 %1102  ;;  %2444 = vmatmul.msk.bf16.vlgmr.msra.gmra.mxu0 %vm854_vm9, %v1012_v60 }
 0x463   : > { %v1104_v62 = vsub.f32 %v1100_v32, %v1103_v61  ;;  %1272 = vmatpush.bf16.msra.mxu0 %v2724_v58 }
 0x465   : > { %v1105_v0 = vmul.f32 1.442695, %v1104_v62 }
 0x467   : > { %2887 = vpow2.f32 %v1105_v0  ;;  %1273 = vmatpush.bf16.msra.mxu0 %v2723_v63 }
 0x46d   : > { %v2888_v1 = vpop.eup %2887 }
 0x46e   : > { %v1107_v2 = vsel %vm854_vm9, %v2888_v1, 0.0 }
 0x46f   : > { %1108 = vadd.xlane.f32.xlu2 %v1107_v2 }
 0x472   : > { %2468 = vmatmul.msk.bf16.vlgmr.msrb.gmra.mxu0 %vm765_vm2, %v3456_v52  ;;  %v1227_v3 = vpop.xlane.xlu2 %1226 }
 0x473   : > { %v1228_v4 = vsub.f32 %v1224_v36, %v1227_v3 }
 0x475   : > { %v1229_v5 = vmul.f32 1.442695, %v1228_v4  ;;  %v2862_v4 = vld [vmem:[#allocation4] ss:$0 sm:$0xff] }
 0x477   : > { %2889 = vpow2.f32 %v1229_v5 }
 0x47d   : > { %v3514_v8 = vpop.eup %2889 }
 0x47e   : > { %v1231_v9 = vsel %vm854_vm9, %v3514_v8, 0.0 }
 0x47f   : > { %1232 = vadd.xlane.f32.xlu1 %v1231_v9 }
 0x482   : > { %2492 = vmatmul.msk.bf16.vlgmr.msra.gmra.mxu0 %vm765_vm2, %v3456_v52 }
 0x4d4   : > { %v863_v10 = vpop.xlane.xlu1 %862 }
 0x4d5   : > { %2891 = vrcp.f32 %v863_v10  ;;  %v875_v16 = vand.u32 2147483648, %v863_v10  ;;  %v873_v19 = vand.u32 2147483647, %v863_v10  ;;  %vm869_vm15 = vweird.f32 %v863_v10 }
 0x4d7   : > { %v876_v6 = vor.u32 1.1754944e-38, %v875_v16  ;;  %vm874_vm1 = vcmp.eq.f32.partialorder %v873_v19, 8.507059e+37  ;;  %v2734_v19 = vld [vmem:[%s3721_s12 + $0x38] sm:$0xff] }
 0x4d8   : > { %1442 = vmatpush.bf16.msra.mxu3 %v2734_v19 }
 0x4db   : > { %v2892_v11 = vpop.eup %2891 }
 0x4dc   : > { %v865_v12 = vmul.f32 %v2892_v11, %v863_v10  ;;  %vm870_vm14 = vweird.f32 %v2892_v11 }
 0x4dd   : > { %vm871_vm0 = vmor %vm869_vm15, %vm870_vm14 }
 0x4de   : > { %v866_v15 = vsub.f32 1.0, %v865_v12 }
 0x4df   : > { %v3520_v17 = vpop.f32.mrf.mxu0 }
 0x4e0   : > { %v867_v18 = vmul.f32 %v2892_v11, %v866_v15 }
 0x4e2   : > { %v868_v20 = vadd.f32 %v2892_v11, %v867_v18  ;;  %v1109_v21 = vpop.xlane.xlu2 %1108 }
 0x4e3   : > { %2893 = vrcp.f32 %v1109_v21  ;;  %v1121_v29 = vand.u32 2147483648, %v1109_v21  ;;  %v1119_v31 = vand.u32 2147483647, %v1109_v21  ;;  %vm1115_vm4 = vweird.f32 %v1109_v21 }
 0x4e4   : > { %v872_v22 = vsel %vm871_vm0, %v2892_v11, %v868_v20 }
 0x4e5   : > { %v877_v52 = vsel %vm874_vm1, %v876_v6, %v872_v22  ;;  %v1122_v35 = vor.u32 1.1754944e-38, %v1121_v29  ;;  %vm1120_vm6 = vcmp.eq.f32.partialorder %v1119_v31, 8.507059e+37  ;;  %v2733_v6 = vld [vmem:[%s3721_s12 + $0x30] sm:$0xff] }
 0x4e6   : > { %v878_v7 = vmul.f32 %v2886_v57, %v877_v52  ;;  %1443 = vmatpush.bf16.msra.mxu3 %v2733_v6  ;;  %v2732_v52 = vld [vmem:[%s3721_s12 + $0x28] sm:$0xff]  ;;  %v2729_v29 = vld [vmem:[%s3721_s12 + $0x10] sm:$0xff] }
 0x4e7   : > { %v1032_v24 = vpop.f32.mrf.mxu0 }
 0x4e8   : > { %v908_v25 = vpack.c.bf16 %v878_v7, %v878_v7  ;;  %v2731_v7 = vld [vmem:[%s3721_s12 + $0x20] sm:$0xff] }
 0x4e9   : > { %v2894_v26 = vpop.eup %2893 }
 0x4ea   : > { %v1111_v27 = vmul.f32 %v2894_v26, %v1109_v21  ;;  %2445 = vmatmul.msk.bf16.vlgmr.msra.gmra.mxu1 %vm854_vm9, %v908_v25  ;;  %vm1116_vm3 = vweird.f32 %v2894_v26  ;;  %1444 = vmatpush.bf16.msra.mxu3 %v2732_v52  ;;  %v2744_v52 = vld [vmem:[%s3714_s5 + $0x68] sm:$0xff] }
 0x4eb   : > { %vm1117_vm5 = vmor %vm1115_vm4, %vm1116_vm3 }
 0x4ec   : > { %v1112_v28 = vsub.f32 1.0, %v1111_v27 }
 0x4ee   : > { %v1113_v30 = vmul.f32 %v2894_v26, %v1112_v28  ;;  %1445 = vmatpush.bf16.msra.mxu3 %v2731_v7 }
 0x4ef   : > { %v1151_v32 = vpop.f32.mrf.mxu0 }
 0x4f0   : > { %v1114_v33 = vadd.f32 %v2894_v26, %v1113_v30  ;;  %v1156_v34 = vpack.c.bf16 %v1151_v32, %v1151_v32  ;;  %v2863_v32 = vld [vmem:[#allocation6] ss:$0 sm:$0xff] }
 0x4f2   : > { %v1118_v36 = vsel %vm1117_vm5, %v2894_v26, %v1114_v33  ;;  %v1161_v37 = vsel %vm1017_vm7, %v1156_v34, 0  ;;  %v1233_v38 = vpop.xlane.xlu1 %1232  ;;  %v2730_v26 = vld [vmem:[%s3721_s12 + $0x18] sm:$0xff] }
 0x4f3   : > { %v1123_v39 = vsel %vm1120_vm6, %v1122_v35, %v1118_v36  ;;  %2895 = vrcp.f32 %v1233_v38  ;;  %1170 = vmatpush.bf16.msrb.mxu1 %v1161_v37  ;;  %v1245_v46 = vand.u32 2147483648, %v1233_v38  ;;  %v1243_v48 = vand.u32 2147483647, %v1233_v38  ;;  %1446 = vmatpush.bf16.msra.mxu3 %v2730_v26  ;;  %v2864_v35 = vld [vmem:[#allocation7] ss:$0 sm:$0xff] }
 0x4f4   : > { %v1124_v40 = vmul.f32 %v2888_v1, %v1123_v39  ;;  %vm1239_vm11 = vweird.f32 %v1233_v38  ;;  %v2728_v39 = vld [vmem:[%s3721_s12 + $0x8] sm:$0xff] }
 0x4f5   : > { %v1246_v53 = vor.u32 1.1754944e-38, %v1245_v46  ;;  %vm1244_vm13 = vcmp.eq.f32.partialorder %v1243_v48, 8.507059e+37 }
 0x4f6   : > { %v1155_v42 = vpack.c.bf16 %v1124_v40, %v1124_v40  ;;  %v2727_v40 = vld [vmem:[%s3721_s12] sm:$0xff] }
 0x4f7   : > { %v1153_v41 = vpop.f32.mrf.mxu0  ;;  %1447 = vmatpush.bf16.msra.mxu3 %v2729_v29 }
 0x4f8   : > { %v2865_v41 = vld [vmem:[#allocation9] ss:$0 sm:$0xff] }
 0x4f9   : > { %v2896_v43 = vpop.eup %2895 }
 0x4fa   : > { %v1235_v44 = vmul.f32 %v2896_v43, %v1233_v38  ;;  %2469 = vmatmul.msk.bf16.vlgmr.msrb.gmra.mxu1 %vm854_vm9, %v1155_v42  ;;  %vm1240_vm10 = vweird.f32 %v2896_v43 }
 0x4fb   : > { %vm1241_vm12 = vmor %vm1239_vm11, %vm1240_vm10  ;;  %1448 = vmatpush.bf16.msra.mxu3 %v2728_v39 }
 0x4fc   : > { %v1236_v45 = vsub.f32 1.0, %v1235_v44 }
 0x4fe   : > { %v1237_v47 = vmul.f32 %v2896_v43, %v1236_v45 }
 0x4ff   : > { %v1275_v49 = vpop.f32.mrf.mxu0  ;;  %1449 = vmatpush.bf16.msra.mxu3 %v2727_v40 }
 0x500   : > { %v1238_v50 = vadd.f32 %v2896_v43, %v1237_v47  ;;  %v1280_v51 = vpack.c.bf16 %v1275_v49, %v1275_v49  ;;  %v2866_v47 = vld [vmem:[#allocation10] ss:$0 sm:$0xff] }
 0x502   : > { %v1242_v54 = vsel %vm1241_vm12, %v2896_v43, %v1238_v50  ;;  %v1285_v55 = vsel %vm1017_vm7, %v1280_v51, 0 }
 0x503   : > { %v1247_v56 = vsel %vm1244_vm13, %v1246_v53, %v1242_v54  ;;  %1294 = vmatpush.bf16.msra.mxu1 %v1285_v55 }
 0x504   : > { %v1248_v57 = vmul.f32 %v3514_v8, %v1247_v56 }
 0x506   : > { %v1279_v59 = vpack.c.bf16 %v1248_v57, %v1248_v57 }
 0x507   : > { %v1277_v58 = vpop.f32.mrf.mxu0 }
 0x50a   : > { %2493 = vmatmul.msk.bf16.vlgmr.msra.gmra.mxu1 %vm854_vm9, %v1279_v59  ;;  %v2738_v59 = vld [vmem:[#allocation2 + $0x48] sm:$0xff] }
 0x567   : > { %v1049_v60 = vpop.f32.mrf.mxu1 }
 0x568   : > { %v1050_v0 = vadd.f32 %v1049_v60, %v3520_v17  ;;  %v2726_v17 = vld [vmem:[%s3719_s10 + $0x8] sm:$0xff] }
 0x569   : > { %1369 = vmatpush.bf16.msrb.mxu2 %v2726_v17  ;;  %v2736_v60 = vld [vmem:[%s3714_s5 + $0x48] sm:$0xff]  ;;  %v2868_v17 = vld [vmem:[%s3713_s4 + $0x1] ss:$0 sm:$0xff] }
 0x56a   : > { %1522 = vmatpush.bf16.msrb.mxu0 %v2736_v60 }
 0x56f   : > { %v1051_v61 = vpop.f32.mrf.mxu1 }
 0x570   : > { %v2737_v61 = vld [vmem:[#allocation2 + $0x40] sm:$0xff] }
 0x577   : > { %v1172_v62 = vpop.f32.mrf.mxu1 }
 0x578   : > { %v1176_v1 = vadd.f32 %v1172_v62, %v1050_v0  ;;  %v2742_v62 = vld [vmem:[#allocation2 + $0x58] sm:$0xff]  ;;  %v2741_v0 = vld [vmem:[#allocation2 + $0x50] sm:$0xff] }
 0x57f   : > { %v1174_v63 = vpop.f32.mrf.mxu1 }
 0x580   : > { %v2735_v63 = vld [vmem:[%s3714_s5 + $0x40] sm:$0xff] }
 0x581   : > { %1523 = vmatpush.bf16.msrb.mxu0 %v2735_v63 }
 0x587   : > { %v1296_v2 = vpop.f32.mrf.mxu1 }
 0x588   : > { %v1300_v3 = vadd.f32 %v1296_v2, %v1176_v1 }
 0x58a   : > { %v1301_v5 = vadd.f32 %v1300_v3, %v3428_v14  ;;  %v2725_v14 = vld [vmem:[%s3719_s10] sm:$0xff]  ;;  %v2740_v3 = vld [vmem:[%s3714_s5 + $0x58] sm:$0xff] }
 0x58b   : > { %1370 = vmatpush.bf16.msrb.mxu2 %v2725_v14  ;;  %1626 = vmatpush.bf16.msra.mxu0 %v2740_v3 }
 0x58c   : > { %v1306_v9 = vadd.f32 %v2862_v4, %v1301_v5  ;;  %v2739_v5 = vld [vmem:[%s3714_s5 + $0x50] sm:$0xff] }
 0x58e   : > { %v1309_v10 = vsel %vm765_vm2, %v1306_v9, 0.0 }
 0x58f   : > { %1310 = vadd.xlane.f32.xlu2 %v1309_v10  ;;  %v1298_v8 = vpop.f32.mrf.mxu1  ;;  %1594 = vmatpush.bf16.msra.mxu2 %v2738_v59 }
 0x590   : > { %1627 = vmatpush.bf16.msra.mxu0 %v2739_v5 }
 0x593   : > { %1595 = vmatpush.bf16.msra.mxu2 %v2737_v61 }
 0x602   : > { %v1311_v11 = vpop.xlane.xlu2 %1310 }
 0x603   : > { %v1312_v12 = vmul.f32 %v1311_v11, %v3432_v23 }
 0x605   : > { %v1313_v15 = vsub.f32 %v1306_v9, %v1312_v12 }
 0x607   : > { %v1314_v16 = vmul.f32 %v1313_v15, %v1313_v15 }
 0x609   : > { %v1315_v18 = vsel %vm765_vm2, %v1314_v16, 0.0  ;;  %v2867_v16 = vld [vmem:[%s3712_s3 + $0x1] ss:$0 sm:$0xff] }
 0x60a   : > { %1316 = vadd.xlane.f32.xlu1 %v1315_v18 }
 0x67d   : > { %v1317_v20 = vpop.xlane.xlu1 %1316 }
 0x67e   : > { %v1318_v21 = vmul.f32 %v1317_v20, %v3432_v23 }
 0x680   : > { %v1319_v22 = vadd.f32 1e-05, %v1318_v21 }
 0x682   : > { %2897 = vrsqrt.f32 %v1319_v22  ;;  %vm1326_vm15 = vweird.f32 %v1319_v22 }
 0x688   : > { %v2898_v24 = vpop.eup %2897 }
 0x689   : > { %v1321_v25 = vmul.f32 %v2898_v24, %v1319_v22  ;;  %vm1327_vm14 = vweird.f32 %v2898_v24 }
 0x68a   : > { %vm1328_vm0 = vmor %vm1326_vm15, %vm1327_vm14 }
 0x68b   : > { %v1322_v27 = vmul.f32 %v2898_v24, %v1321_v25 }
 0x68d   : > { %v1323_v28 = vmul.f32 0.5, %v1322_v27 }
 0x68f   : > { %v1324_v30 = vsub.f32 1.5, %v1323_v28 }
 0x691   : > { %v1325_v31 = vmul.f32 %v2898_v24, %v1324_v30 }
 0x693   : > { %v1329_v33 = vsel %vm1328_vm0, %v2898_v24, %v1325_v31  ;;  %v2743_v24 = vld [vmem:[%s3714_s5 + $0x60] sm:$0xff]  ;;  %v2748_v31 = vld [vmem:[%s3714_s5 + $0x78] sm:$0xff] }
 0x694   : > { %v1330_v34 = vmul.f32 %v1329_v33, %v1313_v15  ;;  %v2747_v33 = vld [vmem:[%s3714_s5 + $0x70] sm:$0xff] }
 0x696   : > { %v1334_v36 = vmul.f32 %v2863_v32, %v1330_v34 }
 0x698   : > { %v1338_v37 = vadd.f32 %v2864_v35, %v1334_v36 }
 0x69a   : > { %v1339_v38 = vpack.c.bf16 %v1338_v37, %v1338_v37 }
 0x69c   : > { %2502 = vmatmul.msk.bf16.vlgmr.msrb.gmra.mxu2 %vm765_vm2, %v1339_v38 }
 0x69d   : > { %1698 = vmatpush.bf16.msrb.mxu2 %v2742_v62 }
 0x6a1   : > { %1699 = vmatpush.bf16.msrb.mxu2 %v2741_v0 }
 0x71f   : > { %v1372_v42 = vpop.f32.mrf.mxu2 }
 0x720   : > { %v1373_v43 = vadd.f32 %v2865_v41, %v1372_v42 }
 0x722   : > { %v1376_v44 = vmax.f32 %v1373_v43, 0.0 }
 0x724   : > { %v1377_v45 = vpack.c.bf16 %v1376_v44, %v1376_v44 }
 0x726   : > { %1450 = vmatmul.bf16.vlgmr.msra.gmra.mxu3 %v1377_v45 }
 0x727   : > { %v1374_v46 = vpop.f32.mrf.mxu2 }
 0x7a9   : > { %v1451_v48 = vpop.f32.mrf.mxu3 }
 0x7aa   : > { %v1455_v49 = vadd.f32 %v1451_v48, %v1306_v9 }
 0x7ac   : > { %v3565_v50 = vadd.f32 %v2866_v47, %v1455_v49 }
 0x7ae   : > { %v1465_v51 = vsel %vm765_vm2, %v3565_v50, 0.0 }
 0x7af   : > { %1466 = vadd.xlane.f32.xlu2 %v1465_v51 }
 0x7b1   : > { %v1453_v53 = vpop.f32.mrf.mxu3 }
 0x822   : > { %v1467_v54 = vpop.xlane.xlu2 %1466 }
 0x823   : > { %v1468_v55 = vmul.f32 %v1467_v54, %v3432_v23 }
 0x825   : > { %v1469_v56 = vsub.f32 %v3565_v50, %v1468_v55 }
 0x827   : > { %v1470_v57 = vmul.f32 %v1469_v56, %v1469_v56 }
 0x829   : > { %v1471_v58 = vsel %vm765_vm2, %v1470_v57, 0.0 }
 0x82a   : > { %1472 = vadd.xlane.f32.xlu1 %v1471_v58 }
 0x89d   : > { %v1473_v1 = vpop.xlane.xlu1 %1472 }
 0x89e   : > { %v1474_v2 = vmul.f32 %v1473_v1, %v3432_v23 }
 0x8a0   : > { %v1475_v4 = vadd.f32 1e-05, %v1474_v2 }
 0x8a2   : > { %2899 = vrsqrt.f32 %v1475_v4  ;;  %vm1482_vm3 = vweird.f32 %v1475_v4 }
 0x8a8   : > { %v2900_v9 = vpop.eup %2899 }
 0x8a9   : > { %v1477_v10 = vmul.f32 %v2900_v9, %v1475_v4  ;;  %vm1483_vm1 = vweird.f32 %v2900_v9 }
 0x8aa   : > { %vm1484_vm4 = vmor %vm1482_vm3, %vm1483_vm1 }
 0x8ab   : > { %v1478_v8 = vmul.f32 %v2900_v9, %v1477_v10 }
 0x8ad   : > { %v1479_v11 = vmul.f32 0.5, %v1478_v8 }
 0x8af   : > { %v1480_v12 = vsub.f32 1.5, %v1479_v11 }
 0x8b1   : > { %v1481_v15 = vmul.f32 %v2900_v9, %v1480_v12 }
 0x8b3   : > { %v1485_v18 = vsel %vm1484_vm4, %v2900_v9, %v1481_v15 }
 0x8b4   : > { %v1486_v14 = vmul.f32 %v1485_v18, %v1469_v56 }
 0x8b6   : > { %v1490_v19 = vmul.f32 %v2867_v16, %v1486_v14 }
 0x8b8   : > { %v1494_v20 = vadd.f32 %v2868_v17, %v1490_v19  ;;  %v2746_v17 = vld [vmem:[#allocation2 + $0x68] sm:$0xff] }
 0x8ba   : > { %v3591_v21 = vpack.c.bf16 %v1494_v20, %v1494_v20  ;;  %v2745_v20 = vld [vmem:[#allocation2 + $0x60] sm:$0xff] }
 0x8bc   : > { %2549 = vmatmul.msk.bf16.vlgmr.msrb.gmra.mxu0 %vm765_vm2, %v3591_v21  ;;  %2559 = vmatmul.msk.bf16.vlgmr.msra.gmra.mxu2 %vm765_vm2, %v3591_v21  ;;  %v1514_v6 = vsel %vm765_vm2, %v3591_v21, 0 }
 0x8bd   : > { %1540 = vmatpush.bf16.xpose.msrb.mxu1 %v1514_v6  ;;  %1786 = vmatpush.bf16.xpose.msra.mxu2 %v1514_v6 }
 0x8c5   : > { %1644 = vmatpush.bf16.xpose.msra.mxu1 %v1514_v6 }
 0x8cc   : > { %2572 = vmatmul.msk.bf16.vlgmr.msra.gmra.mxu0 %vm765_vm2, %v3591_v21  ;;  %2582 = vmatmul.msk.bf16.vlgmr.msrb.gmra.mxu2 %vm765_vm2, %v3591_v21 }
 0x8cd   : > { %1910 = vmatpush.bf16.xpose.msrb.mxu2 %v1514_v6 }
 0x939   : > { %v1525_v22 = vpop.f32.mrf.mxu0 }
 0x93a   : > { %v1529_v7 = vpack.c.bf16 %v1525_v22, %v1525_v22 }
 0x93c   : > { %2550 = vmatmul.msk.bf16.vlgmr.msrb.gmra.mxu1 %vm765_vm2, %v1529_v7 }
 0x93d   : > { %1768 = vmatpush.bf16.msrb.mxu1 %v2744_v52 }
 0x93f   : > { %v1597_v25 = vpop.f32.mrf.mxu2 }
 0x940   : > { %v1602_v26 = vpack.c.bf16 %v1597_v25, %v1597_v25 }
 0x941   : > { %v1527_v27 = vpop.f32.mrf.mxu0  ;;  %1769 = vmatpush.bf16.msrb.mxu1 %v2743_v24 }
 0x942   : > { %v1730_v28 = vsel %vm1017_vm7, %v1602_v26, 0 }
 0x943   : > { %1739 = vmatpush.bf16.msrb.mxu0 %v1730_v28 }
 0x947   : > { %v1599_v29 = vpop.f32.mrf.mxu2 }
 0x949   : > { %v1629_v30 = vpop.f32.mrf.mxu0 }
 0x94a   : > { %v1633_v32 = vpack.c.bf16 %v1629_v30, %v1629_v30 }
 0x94c   : > { %2573 = vmatmul.msk.bf16.vlgmr.msra.gmra.mxu1 %vm765_vm2, %v1633_v32 }
 0x94d   : > { %1892 = vmatpush.bf16.msra.mxu1 %v2748_v31 }
 0x94f   : > { %v1701_v34 = vpop.f32.mrf.mxu2 }
 0x950   : > { %v1706_v35 = vpack.c.bf16 %v1701_v34, %v1701_v34 }
 0x951   : > { %v1631_v36 = vpop.f32.mrf.mxu0  ;;  %1893 = vmatpush.bf16.msra.mxu1 %v2747_v33 }
 0x952   : > { %v1711_v37 = vsel %vm1017_vm7, %v1706_v35, 0 }
 0x953   : > { %1720 = vmatpush.bf16.msrb.mxu3 %v1711_v37  ;;  %v2750_v37 = vld [vmem:[#allocation2 + $0x78] sm:$0xff] }
 0x957   : > { %v1703_v38 = vpop.f32.mrf.mxu2  ;;  %1840 = vmatpush.bf16.msra.mxu3 %v2746_v17 }
 0x95b   : > { %1841 = vmatpush.bf16.msra.mxu3 %v2745_v20 }
 0x95c   : > { %2597 = vmatmul.msk.bf16.vlgmr.msrb.gmra.mxu1 %vm765_vm2, %v3591_v21 }
 0x96c   : > { %2621 = vmatmul.msk.bf16.vlgmr.msra.gmra.mxu1 %vm765_vm2, %v3591_v21 }
 0x9b9   : > { %v1542_v39 = vpop.f32.mrf.mxu1 }
 0x9ba   : > { %v1546_v40 = vsel %vm3490_vm8, %v1542_v39, -inf }
 0x9bb   : > { %v1547_v41 = vsel %vm854_vm9, %v1546_v40, -inf }
 0x9bc   : > { %1548 = vmax.xlane.f32.xlu1 %v1547_v41  ;;  %v2749_v41 = vld [vmem:[#allocation2 + $0x70] sm:$0xff] }
 0x9c1   : > { %v1544_v42 = vpop.f32.mrf.mxu1 }
 0x9c9   : > { %v1646_v43 = vpop.f32.mrf.mxu1 }
 0x9ca   : > { %v1650_v44 = vsel %vm3490_vm8, %v1646_v43, -inf }
 0x9cb   : > { %v1651_v45 = vsel %vm854_vm9, %v1650_v44, -inf }
 0x9cc   : > { %1652 = vmax.xlane.f32.xlu2 %v1651_v45 }
 0x9d1   : > { %v1648_v46 = vpop.f32.mrf.mxu1 }
 0x9d9   : > { %v1771_v47 = vpop.f32.mrf.mxu1 }
 0x9da   : > { %v1775_v48 = vpack.c.bf16 %v1771_v47, %v1771_v47 }
 0x9dc   : > { %2598 = vmatmul.msk.bf16.vlgmr.msra.gmra.mxu2 %vm765_vm2, %v1775_v48 }
 0x9e1   : > { %v1773_v49 = vpop.f32.mrf.mxu1 }
 0x9e9   : > { %v1895_v51 = vpop.f32.mrf.mxu1 }
 0x9ea   : > { %v1899_v53 = vpack.c.bf16 %v1895_v51, %v1895_v51 }
 0x9ec   : > { %2622 = vmatmul.msk.bf16.vlgmr.msrb.gmra.mxu2 %vm765_vm2, %v1899_v53 }
 0x9f1   : > { %v1897_v54 = vpop.f32.mrf.mxu1 }
 0xa2f   : > { %v1549_v55 = vpop.xlane.xlu1 %1548 }
 0xa30   : > { %v1550_v56 = vsub.f32 %v1546_v40, %v1549_v55 }
 0xa32   : > { %v1551_v57 = vmul.f32 1.442695, %v1550_v56 }
 0xa34   : > { %2901 = vpow2.f32 %v1551_v57 }
 0xa3a   : > { %v2902_v58 = vpop.eup %2901 }
 0xa3b   : > { %v1553_v59 = vsel %vm854_vm9, %v2902_v58, 0.0 }
 0xa3c   : > { %1554 = vadd.xlane.f32.xlu1 %v1553_v59 }
 0xa3f   : > { %v1653_v60 = vpop.xlane.xlu2 %1652 }
 0xa40   : > { %v1654_v61 = vsub.f32 %v1650_v44, %v1653_v60 }
 0xa42   : > { %v1655_v62 = vmul.f32 1.442695, %v1654_v61 }
 0xa44   : > { %2903 = vpow2.f32 %v1655_v62 }
 0xa4a   : > { %v2904_v63 = vpop.eup %2903 }
 0xa4b   : > { %v1657_v0 = vsel %vm854_vm9, %v2904_v63, 0.0 }
 0xa4c   : > { %1658 = vadd.xlane.f32.xlu0 %v1657_v0 }
 0xa5f   : > { %v1788_v1 = vpop.f32.mrf.mxu2 }
 0xa60   : > { %v1792_v2 = vsel %vm3490_vm8, %v1788_v1, -inf }
 0xa61   : > { %v1793_v3 = vsel %vm854_vm9, %v1792_v2, -inf }
 0xa62   : > { %1794 = vmax.xlane.f32.xlu2 %v1793_v3 }
 0xa67   : > { %v1790_v4 = vpop.f32.mrf.mxu2 }
 0xa6f   : > { %v1912_v5 = vpop.f32.mrf.mxu2 }
 0xa70   : > { %v1916_v9 = vsel %vm3490_vm8, %v1912_v5, -inf }
 0xa71   : > { %v1917_v10 = vsel %vm854_vm9, %v1916_v9, -inf }
 0xa72   : > { %1918 = vmax.xlane.f32.xlu0 %v1917_v10 }
 0xa77   : > { %v1914_v8 = vpop.f32.mrf.mxu2 }
 0xaaf   : > { %v1555_v11 = vpop.xlane.xlu1 %1554 }
 0xab0   : > { %2905 = vrcp.f32 %v1555_v11  ;;  %v1567_v18 = vand.u32 2147483648, %v1555_v11  ;;  %v1565_v19 = vand.u32 2147483647, %v1555_v11  ;;  %vm1561_vm6 = vweird.f32 %v1555_v11 }
 0xab2   : > { %v1568_v13 = vor.u32 1.1754944e-38, %v1567_v18  ;;  %vm1566_vm8 = vcmp.eq.f32.partialorder %v1565_v19, 8.507059e+37 }
 0xab6   : > { %v2906_v12 = vpop.eup %2905 }
 0xab7   : > { %v1557_v15 = vmul.f32 %v2906_v12, %v1555_v11  ;;  %vm1562_vm5 = vweird.f32 %v2906_v12 }
 0xab8   : > { %vm1563_vm10 = vmor %vm1561_vm6, %vm1562_vm5 }
 0xab9   : > { %v1558_v16 = vsub.f32 1.0, %v1557_v15 }
 0xabb   : > { %v1559_v14 = vmul.f32 %v2906_v12, %v1558_v16 }
 0xabd   : > { %v1560_v6 = vadd.f32 %v2906_v12, %v1559_v14 }
 0xabf   : > { %v1564_v22 = vsel %vm1563_vm10, %v2906_v12, %v1560_v6  ;;  %v1659_v52 = vpop.xlane.xlu0 %1658 }
 0xac0   : > { %v1569_v7 = vsel %vm1566_vm8, %v1568_v13, %v1564_v22  ;;  %2907 = vrcp.f32 %v1659_v52  ;;  %v1671_v29 = vand.u32 2147483648, %v1659_v52  ;;  %v1669_v31 = vand.u32 2147483647, %v1659_v52 }
 0xac1   : > { %v1570_v24 = vmul.f32 %v2902_v58, %v1569_v7  ;;  %vm1665_vm12 = vweird.f32 %v1659_v52 }
 0xac2   : > { %v1672_v33 = vor.u32 1.1754944e-38, %v1671_v29  ;;  %vm1670_vm14 = vcmp.eq.f32.partialorder %v1669_v31, 8.507059e+37 }
 0xac3   : > { %v1601_v25 = vpack.c.bf16 %v1570_v24, %v1570_v24 }
 0xac5   : > { %2584 = vmatmul.msk.bf16.vlgmr.msrb.gmra.mxu0 %vm854_vm9, %v1601_v25 }
 0xac6   : > { %v2908_v26 = vpop.eup %2907 }
 0xac7   : > { %v1661_v27 = vmul.f32 %v2908_v26, %v1659_v52  ;;  %vm1666_vm11 = vweird.f32 %v2908_v26 }
 0xac8   : > { %vm1667_vm13 = vmor %vm1665_vm12, %vm1666_vm11 }
 0xac9   : > { %v1662_v28 = vsub.f32 1.0, %v1661_v27 }
 0xacb   : > { %v1663_v30 = vmul.f32 %v2908_v26, %v1662_v28 }
 0xacd   : > { %v1664_v32 = vadd.f32 %v2908_v26, %v1663_v30 }
 0xacf   : > { %v1668_v34 = vsel %vm1667_vm13, %v2908_v26, %v1664_v32  ;;  %v2869_v32 = vld [vmem:[#allocation4 + $0x1] ss:$0 sm:$0xff] }
 0xad0   : > { %v1673_v35 = vsel %vm1670_vm14, %v1672_v33, %v1668_v34 }
 0xad1   : > { %v1674_v36 = vmul.f32 %v2904_v63, %v1673_v35 }
 0xad3   : > { %v1705_v38 = vpack.c.bf16 %v1674_v36, %v1674_v36 }
 0xad5   : > { %2583 = vmatmul.msk.bf16.vlgmr.msrb.gmra.mxu3 %vm854_vm9, %v1705_v38  ;;  %v1795_v39 = vpop.xlane.xlu2 %1794 }
 0xad6   : > { %v1796_v40 = vsub.f32 %v1792_v2, %v1795_v39  ;;  %1964 = vmatpush.bf16.msrb.mxu3 %v2750_v37 }
 0xad8   : > { %v1797_v42 = vmul.f32 1.442695, %v1796_v40 }
 0xada   : > { %2909 = vpow2.f32 %v1797_v42  ;;  %1965 = vmatpush.bf16.msrb.mxu3 %v2749_v41  ;;  %v2752_v42 = vld [vmem:[%s3719_s10 + $0x18] sm:$0xff] }
 0xadb   : > { %2066 = vmatpush.bf16.msrb.mxu1 %v2752_v42 }
 0xae0   : > { %v2910_v43 = vpop.eup %2909 }
 0xae1   : > { %v1799_v44 = vsel %vm854_vm9, %v2910_v43, 0.0 }
 0xae2   : > { %1800 = vadd.xlane.f32.xlu2 %v1799_v44 }
 0xae5   : > { %2607 = vmatmul.msk.bf16.vlgmr.msra.gmra.mxu3 %vm765_vm2, %v3591_v21  ;;  %v1919_v45 = vpop.xlane.xlu0 %1918 }
 0xae6   : > { %v1920_v46 = vsub.f32 %v1916_v9, %v1919_v45 }
 0xae8   : > { %v1921_v47 = vmul.f32 1.442695, %v1920_v46  ;;  %v2759_v46 = vld [vmem:[%s3721_s12 + $0x70] sm:$0xff] }
 0xaea   : > { %2911 = vpow2.f32 %v1921_v47 }
 0xaf0   : > { %v2912_v48 = vpop.eup %2911 }
 0xaf1   : > { %v1923_v49 = vsel %vm854_vm9, %v2912_v48, 0.0 }
 0xaf2   : > { %1924 = vadd.xlane.f32.xlu0 %v1923_v49  ;;  %v2757_v49 = vld [vmem:[%s3721_s12 + $0x60] sm:$0xff] }
 0xaf5   : > { %2631 = vmatmul.msk.bf16.vlgmr.msrb.gmra.mxu3 %vm765_vm2, %v3591_v21 }
 0xb42   : > { %v1741_v51 = vpop.f32.mrf.mxu0 }
 0xb4a   : > { %v1743_v53 = vpop.f32.mrf.mxu0 }
 0xb55   : > { %v1801_v54 = vpop.xlane.xlu2 %1800 }
 0xb56   : > { %2913 = vrcp.f32 %v1801_v54  ;;  %v1813_v60 = vand.u32 2147483648, %v1801_v54  ;;  %v1811_v63 = vand.u32 2147483647, %v1801_v54  ;;  %vm1807_vm0 = vweird.f32 %v1801_v54 }
 0xb58   : > { %v1722_v55 = vpop.f32.mrf.mxu3  ;;  %v1814_v1 = vor.u32 1.1754944e-38, %v1813_v60  ;;  %vm1812_vm3 = vcmp.eq.f32.partialorder %v1811_v63, 8.507059e+37  ;;  %v2870_v60 = vld [vmem:[#allocation6 + $0x1] ss:$0 sm:$0xff]  ;;  %v2871_v63 = vld [vmem:[#allocation7 + $0x1] ss:$0 sm:$0xff] }
 0xb59   : > { %v1742_v56 = vadd.f32 %v1741_v51, %v1722_v55 }
 0xb5c   : > { %v2914_v57 = vpop.eup %2913 }
 0xb5d   : > { %v1803_v58 = vmul.f32 %v2914_v57, %v1801_v54  ;;  %vm1808_vm15 = vweird.f32 %v2914_v57  ;;  %v2756_v54 = vld [vmem:[%s3721_s12 + $0x58] sm:$0xff] }
 0xb5e   : > { %vm1809_vm1 = vmor %vm1807_vm0, %vm1808_vm15 }
 0xb5f   : > { %v1804_v59 = vsub.f32 1.0, %v1803_v58 }
 0xb60   : > { %v1724_v61 = vpop.f32.mrf.mxu3 }
 0xb61   : > { %v1805_v62 = vmul.f32 %v2914_v57, %v1804_v59 }
 0xb63   : > { %v1806_v0 = vadd.f32 %v2914_v57, %v1805_v62 }
 0xb65   : > { %v1810_v2 = vsel %vm1809_vm1, %v2914_v57, %v1806_v0  ;;  %v1925_v21 = vpop.xlane.xlu0 %1924  ;;  %v2755_v57 = vld [vmem:[%s3721_s12 + $0x50] sm:$0xff] }
 0xb66   : > { %v1815_v3 = vsel %vm1812_vm3, %v1814_v1, %v1810_v2  ;;  %2915 = vrcp.f32 %v1925_v21  ;;  %v1937_v16 = vand.u32 2147483648, %v1925_v21  ;;  %v1935_v14 = vand.u32 2147483647, %v1925_v21 }
 0xb67   : > { %v1816_v5 = vmul.f32 %v2910_v43, %v1815_v3  ;;  %vm1931_vm5 = vweird.f32 %v1925_v21  ;;  %v2760_v43 = vld [vmem:[%s3721_s12 + $0x78] sm:$0xff]  ;;  %v2753_v3 = vld [vmem:[%s3721_s12 + $0x40] sm:$0xff] }
 0xb68   : > { %v1843_v4 = vpop.f32.mrf.mxu3  ;;  %v1938_v20 = vor.u32 1.1754944e-38, %v1937_v16  ;;  %vm1936_vm10 = vcmp.eq.f32.partialorder %v1935_v14, 8.507059e+37  ;;  %2140 = vmatpush.bf16.msra.mxu2 %v2760_v43 }
 0xb69   : > { %v1848_v9 = vpack.c.bf16 %v1843_v4, %v1843_v4  ;;  %v1847_v12 = vpack.c.bf16 %v1816_v5, %v1816_v5  ;;  %v2872_v4 = vld [vmem:[#allocation9 + $0x1] ss:$0 sm:$0xff] }
 0xb6b   : > { %v1853_v10 = vsel %vm1017_vm7, %v1848_v9, 0 }
 0xb6c   : > { %v2916_v8 = vpop.eup %2915  ;;  %1862 = vmatpush.bf16.msra.mxu0 %v1853_v10  ;;  %2141 = vmatpush.bf16.msra.mxu2 %v2759_v46 }
 0xb6d   : > { %v1927_v11 = vmul.f32 %v2916_v8, %v1925_v21  ;;  %vm1932_vm4 = vweird.f32 %v2916_v8  ;;  %v2754_v21 = vld [vmem:[%s3721_s12 + $0x48] sm:$0xff] }
 0xb6e   : > { %vm1933_vm6 = vmor %vm1931_vm5, %vm1932_vm4 }
 0xb6f   : > { %v1928_v15 = vsub.f32 1.0, %v1927_v11  ;;  %2608 = vmatmul.msk.bf16.vlgmr.msra.gmra.mxu0 %vm854_vm9, %v1847_v12  ;;  %v2873_v12 = vld [vmem:[#allocation10 + $0x1] ss:$0 sm:$0xff] }
 0xb70   : > { %v1845_v18 = vpop.f32.mrf.mxu3 }
 0xb71   : > { %v1929_v17 = vmul.f32 %v2916_v8, %v1928_v15 }
 0xb73   : > { %v1930_v19 = vadd.f32 %v2916_v8, %v1929_v17 }
 0xb75   : > { %v1934_v6 = vsel %vm1933_vm6, %v2916_v8, %v1930_v19 }
 0xb76   : > { %v1939_v13 = vsel %vm1936_vm10, %v1938_v20, %v1934_v6 }
 0xb77   : > { %v1940_v52 = vmul.f32 %v2912_v48, %v1939_v13  ;;  %v2758_v48 = vld [vmem:[%s3721_s12 + $0x68] sm:$0xff] }
 0xb78   : > { %v1967_v22 = vpop.f32.mrf.mxu3  ;;  %2142 = vmatpush.bf16.msra.mxu2 %v2758_v48 }
 0xb79   : > { %v1972_v7 = vpack.c.bf16 %v1967_v22, %v1967_v22  ;;  %v1971_v25 = vpack.c.bf16 %v1940_v52, %v1940_v52  ;;  %v2762_v52 = vld [vmem:[%s3725_s16 + $0x8] sm:$0xff] }
 0xb7a   : > { %2222 = vmatpush.bf16.msra.mxu3 %v2762_v52 }
 0xb7b   : > { %v1977_v24 = vsel %vm1017_vm7, %v1972_v7, 0  ;;  %v2761_v7 = vld [vmem:[%s3725_s16] sm:$0xff] }
 0xb7c   : > { %1986 = vmatpush.bf16.msrb.mxu0 %v1977_v24  ;;  %2143 = vmatpush.bf16.msra.mxu2 %v2757_v49 }
 0xb7e   : > { %2223 = vmatpush.bf16.msra.mxu3 %v2761_v7 }
 0xb7f   : > { %2632 = vmatmul.msk.bf16.vlgmr.msrb.gmra.mxu0 %vm854_vm9, %v1971_v25 }
 0xb80   : > { %v1969_v26 = vpop.f32.mrf.mxu3  ;;  %2144 = vmatpush.bf16.msra.mxu2 %v2756_v54 }
 0xb84   : > { %2145 = vmatpush.bf16.msra.mxu2 %v2755_v57 }
 0xb88   : > { %2146 = vmatpush.bf16.msra.mxu2 %v2754_v21 }
 0xb8c   : > { %2147 = vmatpush.bf16.msra.mxu2 %v2753_v3 }
 0xbec   : > { %v1864_v27 = vpop.f32.mrf.mxu0 }
 0xbed   : > { %v1868_v29 = vadd.f32 %v1864_v27, %v1742_v56 }
 0xbf4   : > { %v1866_v28 = vpop.f32.mrf.mxu0 }
 0xbfc   : > { %v1988_v30 = vpop.f32.mrf.mxu0 }
 0xbfd   : > { %v1992_v31 = vadd.f32 %v1988_v30, %v1868_v29 }
 0xbff   : > { %v1993_v33 = vadd.f32 %v1992_v31, %v3565_v50  ;;  %v2751_v50 = vld [vmem:[%s3719_s10 + $0x10] sm:$0xff] }
 0xc00   : > { %2067 = vmatpush.bf16.msrb.mxu1 %v2751_v50 }
 0xc01   : > { %v1999_v34 = vadd.f32 %v2869_v32, %v1993_v33  ;;  %v2874_v33 = vld [vmem:[%s3723_s14] ss:$0 sm:$0xff] }
 0xc03   : > { %v2004_v35 = vsel %vm765_vm2, %v1999_v34, 0.0 }
 0xc04   : > { %v1990_v36 = vpop.f32.mrf.mxu0  ;;  %2005 = vadd.xlane.f32.xlu1 %v2004_v35 }
 0xc05   : > { %v2875_v36 = vld [vmem:[#allocation12] ss:$0 sm:$0xff] }
 0xc77   : > { %v2006_v37 = vpop.xlane.xlu1 %2005 }
 0xc78   : > { %v2007_v38 = vmul.f32 %v2006_v37, %v3432_v23 }
 0xc7a   : > { %v2008_v39 = vsub.f32 %v1999_v34, %v2007_v38 }
 0xc7c   : > { %v2009_v40 = vmul.f32 %v2008_v39, %v2008_v39 }
 0xc7e   : > { %v2010_v41 = vsel %vm765_vm2, %v2009_v40, 0.0 }
 0xc7f   : > { %2011 = vadd.xlane.f32.xlu2 %v2010_v41 }
 0xcf2   : > { %v2012_v44 = vpop.xlane.xlu2 %2011 }
 0xcf3   : > { %v2013_v45 = vmul.f32 %v2012_v44, %v3432_v23 }
 0xcf5   : > { %v2014_v47 = vadd.f32 1e-05, %v2013_v45 }
 0xcf7   : > { %2917 = vrsqrt.f32 %v2014_v47  ;;  %vm2021_vm9 = vweird.f32 %v2014_v47 }
 0xcfd   : > { %v2918_v51 = vpop.eup %2917 }
 0xcfe   : > { %v2016_v53 = vmul.f32 %v2918_v51, %v2014_v47  ;;  %vm2022_vm7 = vweird.f32 %v2918_v51 }
 0xcff   : > { %vm2023_vm8 = vmor %vm2021_vm9, %vm2022_vm7 }
 0xd00   : > { %v2017_v55 = vmul.f32 %v2918_v51, %v2016_v53 }
 0xd02   : > { %v2018_v56 = vmul.f32 0.5, %v2017_v55 }
 0xd04   : > { %v2019_v58 = vsub.f32 1.5, %v2018_v56 }
 0xd06   : > { %v2020_v59 = vmul.f32 %v2918_v51, %v2019_v58 }
 0xd08   : > { %v2024_v61 = vsel %vm2023_vm8, %v2918_v51, %v2020_v59 }
 0xd09   : > { %v2025_v62 = vmul.f32 %v2024_v61, %v2008_v39  ;;  %v2876_v39 = vld [vmem:[#allocation13] ss:$0 sm:$0xff] }
 0xd0b   : > { %v2029_v0 = vmul.f32 %v2870_v60, %v2025_v62 }
 0xd0d   : > { %v2033_v1 = vadd.f32 %v2871_v63, %v2029_v0 }
 0xd0f   : > { %v2034_v2 = vpack.c.bf16 %v2033_v1, %v2033_v1 }
 0xd11   : > { %2645 = vmatmul.msk.bf16.vlgmr.msrb.gmra.mxu1 %vm765_vm2, %v2034_v2 }
 0xd8e   : > { %v2069_v5 = vpop.f32.mrf.mxu1 }
 0xd8f   : > { %v2070_v9 = vadd.f32 %v2872_v4, %v2069_v5 }
 0xd91   : > { %v2073_v10 = vmax.f32 %v2070_v9, 0.0 }
 0xd93   : > { %v2074_v8 = vpack.c.bf16 %v2073_v10, %v2073_v10 }
 0xd95   : > { %2148 = vmatmul.bf16.vlgmr.msra.gmra.mxu2 %v2074_v8 }
 0xd96   : > { %v2071_v11 = vpop.f32.mrf.mxu1 }
 0xe18   : > { %v2149_v15 = vpop.f32.mrf.mxu2 }
 0xe19   : > { %v2153_v16 = vadd.f32 %v2149_v15, %v1999_v34 }
 0xe1b   : > { %v2159_v18 = vadd.f32 %v2873_v12, %v2153_v16 }
 0xe1d   : > { %v2162_v17 = vsel %vm765_vm2, %v2159_v18, 0.0 }
 0xe1e   : > { %2163 = vadd.xlane.f32.xlu0 %v2162_v17 }
 0xe20   : > { %v2151_v14 = vpop.f32.mrf.mxu2 }
 0xe91   : > { %v2164_v19 = vpop.xlane.xlu0 %2163 }
 0xe92   : > { %v2165_v20 = vmul.f32 %v2164_v19, %v3432_v23 }
 0xe94   : > { %v2166_v6 = vsub.f32 %v2159_v18, %v2165_v20 }
 0xe96   : > { %v2167_v13 = vmul.f32 %v2166_v6, %v2166_v6 }
 0xe98   : > { %v2168_v22 = vsel %vm765_vm2, %v2167_v13, 0.0 }
 0xe99   : > { %2169 = vadd.xlane.f32.xlu1 %v2168_v22 }
 0xf0c   : > { %v2170_v24 = vpop.xlane.xlu1 %2169 }
 0xf0d   : > { %v2171_v25 = vmul.f32 %v2170_v24, %v3432_v23 }
 0xf0f   : > { %v2172_v26 = vadd.f32 1e-05, %v2171_v25 }
 0xf11   : > { %2919 = vrsqrt.f32 %v2172_v26  ;;  %vm2179_vm12 = vweird.f32 %v2172_v26 }
 0xf17   : > { %v2920_v27 = vpop.eup %2919 }
 0xf18   : > { %v2174_v28 = vmul.f32 %v2920_v27, %v2172_v26  ;;  %vm2180_vm11 = vweird.f32 %v2920_v27 }
 0xf19   : > { %vm2181_vm13 = vmor %vm2179_vm12, %vm2180_vm11 }
 0xf1a   : > { %v2175_v29 = vmul.f32 %v2920_v27, %v2174_v28 }
 0xf1c   : > { %v2176_v30 = vmul.f32 0.5, %v2175_v29 }
 0xf1e   : > { %v2177_v31 = vsub.f32 1.5, %v2176_v30 }
 0xf20   : > { %v2178_v32 = vmul.f32 %v2920_v27, %v2177_v31 }
 0xf22   : > { %v2182_v34 = vsel %vm2181_vm13, %v2920_v27, %v2178_v32 }
 0xf23   : > { %v2183_v35 = vmul.f32 %v2182_v34, %v2166_v6 }
 0xf25   : > { %v2187_v23 = vmul.f32 %v2874_v33, %v2183_v35 }
 0xf27   : > { %v2191_v37 = vadd.f32 %v2875_v36, %v2187_v23 }
 0xf29   : > { %v2192_v38 = vpack.c.bf16 %v2191_v37, %v2191_v37 }
 0xf2b   : > { %2702 = vmatmul.msk.bf16.vlgmr.msra.gmra.mxu3 %vm765_vm2, %v2192_v38 }
 0xfae   : > { %v2225_v40 = vpop.f32.mrf.mxu3 }
 0xfaf   : > { %v2226_v41 = vadd.f32 %v2876_v39, %v2225_v40 }
 0xfb1   : > { %2229 = vst [vmem:[%s699_s28] sm:$0xff] %v2226_v41 }
 0xfb6   : > { %v2227_v42 = vpop.f32.mrf.mxu3 }
 0xfb7 PF: > { %s3749_s30 = sld [smem:[#allocation20_spill]] }
 0xfbd   : > { %s33_s27 = sadd.s32 1, %s3749_s30  }
 0xfbe   : > { %p30_p7 = scmp.ge.s32.totalorder %s33_s27, 4  }
 0xfc0   :  { %32 = sbr.rel (!%p30_p7) target bundleno = 13 (0xd), region = 178 }
 0xfc5   :  { %2249 = vsyncpa [#allocation3], 1 }
 0xfc6   :  { %2251 = vsyncpa [#allocation3 + $0x1], 1 }
 0xfc7   :  { %2252 = vsyncpa [#allocation5], 1 }
 0xfc8   :  { %2253 = vsyncpa [#allocation8], 1 }
 0xfc9   :  { %2254 = vsyncpa [#allocation11], 1 }
 0xfca   :  { %2255 = vsyncpa [#allocation14], 1 }

</bundles_post_ra>
